<compile_context>
chip_gen: v6e
topology: v6e:2x2x1
jax: 0.10.0
libtpu: 0.0.40
codegen_flags: <defaults>
</compile_context>

<pallas_src>
import math

import jax
import jax.numpy as jnp
import numpy as np
from jax.experimental import pallas as pl
from jax.experimental.pallas import tpu as pltpu

# ---- model hyper-parameters (small, consistent with the module) ----
EMB = 32          # emb_size
N_HEAD = 4        # n_head
D_K = EMB // N_HEAD
D_FF = 64         # d_ff
S = 8             # decoder (target) sequence length
S_ENC = 8         # encoder sequence length
B = 2             # batch
EPS = 1e-5        # nn.LayerNorm default eps


# ---------------------------------------------------------------------------
# kernel factory (closes over static shapes)
# ---------------------------------------------------------------------------
def _make_kernel(b, s, s_enc, e, n_head, d_ff):
    d_k = e // n_head
    n_x = b * s
    n_enc = b * s_enc

    def layer_norm(h, gamma, beta):
        mu = jnp.mean(h, axis=-1, keepdims=True)
        var = jnp.mean((h - mu) ** 2, axis=-1, keepdims=True)   # biased, like torch LN
        return (h - mu) * jax.lax.rsqrt(var + EPS) * gamma + beta

    def split_heads(t_flat, seq):
        # (b*seq, e) -> (n_head*b, seq, d_k); head-major batch ordering.
        return jnp.concatenate(
            [t_flat[:, h * d_k:(h + 1) * d_k].reshape(b, seq, d_k)
             for h in range(n_head)], axis=0)

    def attend(q_flat, k_flat, v_flat, wo, bias, sq, sk):
        """Multi-head attention with heads folded into the batch dim.

        q_flat: (b*sq, e), k_flat/v_flat: (b*sk, e) -- already projected, with
        the 1/sqrt(d_k) scale folded into q.  wo: (e, e) output projection.
        bias: (sq, sk) additive mask.  Returns (b*sq, e) WITHOUT output bias.
        """
        qh = split_heads(q_flat, sq)       # (H*b, sq, d_k)
        kh = split_heads(k_flat, sk)       # (H*b, sk, d_k)
        vh = split_heads(v_flat, sk)       # (H*b, sk, d_k)
        scores = jnp.einsum('bqd,bkd->bqk', qh, kh,
                            preferred_element_type=jnp.float32)
        scores = scores + bias             # broadcast over (H*b)
        scores = scores - jnp.max(scores, axis=-1, keepdims=True)
        p = jnp.exp(scores)
        p = p * pl.reciprocal(jnp.sum(p, axis=-1, keepdims=True), approx=True)
        ctx = jnp.einsum('bqk,bkd->bqd', p, vh,
                         preferred_element_type=jnp.float32)   # (H*b, sq, d_k)
        # merge heads back to (b*sq, e) and apply W_o in ONE matmul
        ctx_flat = jnp.concatenate(
            [ctx[h * b:(h + 1) * b].reshape(b * sq, d_k)
             for h in range(n_head)], axis=-1)
        return jnp.dot(ctx_flat, wo, preferred_element_type=jnp.float32)

    def kernel(act_ref, wslab_ref, w2_ref, vec_ref, out_ref):
        x = act_ref[0:n_x, :]                 # (b*s, e)
        enc = act_ref[n_x:n_x + n_enc, :]     # (b*s_enc, e)

        # static lane slices of the packed weight slab (zero-cost views)
        wslab = wslab_ref[...]
        off = 0
        w_qkv_s = wslab[:, off:off + 3 * e]; off += 3 * e
        wo_s = wslab[:, off:off + e];        off += e
        w_q_c = wslab[:, off:off + e];       off += e
        w_kv_c = wslab[:, off:off + 2 * e];  off += 2 * e
        wo_c = wslab[:, off:off + e];        off += e
        w1 = wslab[:, off:off + d_ff]

        # packed bias / LayerNorm / additive-mask buffer
        vec = vec_ref[...]
        b_qkv_s = vec[0:1, :3 * e]
        b_o_s = vec[1:2, :e]
        b_q_c = vec[2:3, :e]
        b_kv_c = vec[3:4, :2 * e]
        b_o_c = vec[4:5, :e]
        b1 = vec[5:6, :d_ff]
        b2 = vec[6:7, :e]
        ln_g = vec[7:10, :e]
        ln_b = vec[10:13, :e]
        tgt_bias = vec[13:13 + s, :s]
        src_bias = vec[13 + s:13 + 2 * s, :s_enc]

        # ---- self-attention + residual + LayerNorm (dropout = identity) ----
        qkv = jnp.dot(x, w_qkv_s, preferred_element_type=jnp.float32) + b_qkv_s
        attn = attend(qkv[:, :e], qkv[:, e:2 * e], qkv[:, 2 * e:3 * e],
                      wo_s, tgt_bias, s, s) + b_o_s
        x1 = layer_norm(x + attn, ln_g[0:1], ln_b[0:1])

        # ---- cross-attention + residual + LayerNorm ----
        qc = jnp.dot(x1, w_q_c, preferred_element_type=jnp.float32) + b_q_c
        kvc = jnp.dot(enc, w_kv_c, preferred_element_type=jnp.float32) + b_kv_c
        attn2 = attend(qc, kvc[:, :e], kvc[:, e:2 * e],
                       wo_c, src_bias, s, s_enc) + b_o_c
        x2 = layer_norm(x1 + attn2, ln_g[1:2], ln_b[1:2])

        # ---- position-wise feed-forward + residual + LayerNorm ----
        h = jnp.maximum(
            jnp.dot(x2, w1, preferred_element_type=jnp.float32) + b1, 0.0)
        ff = jnp.dot(h, w2_ref[...], preferred_element_type=jnp.float32) + b2
        out_ref[...] = layer_norm(x2 + ff, ln_g[2:3], ln_b[2:3])

    return kernel


# ---------------------------------------------------------------------------
# wrapper
# ---------------------------------------------------------------------------
def decoder_layer(x, enc, tgt_mask, src_mask, params):
    b, s, e = x.shape
    s_enc = enc.shape[1]
    sa_w, sa_b, ca_w, ca_b, w1, b1, w2, b2, ln_g, ln_b = params
    d_ff = w1.shape[1]
    n_head = N_HEAD
    assert e % n_head == 0
    assert 3 * e <= 128 and 2 * e <= 128 and d_ff <= 128
    assert s <= 128 and s_enc <= 128
    scale = 1.0 / math.sqrt(e // n_head)

    # --- one-time parameter packing / pre-transforms (wrapper side) ---
    # One lane-packed weight slab: [QKV_self | Wo_self | Wq_cross | KV_cross |
    # Wo_cross | W1]; attention scale folded into W_q columns.
    w_slab = jnp.concatenate(
        [sa_w[0] * scale, sa_w[1], sa_w[2],   # self-attn fused QKV   (e, 3e)
         sa_w[3],                             # self-attn W_o         (e, e)
         ca_w[0] * scale,                     # cross-attn W_q        (e, e)
         ca_w[1], ca_w[2],                    # cross-attn fused KV   (e, 2e)
         ca_w[3],                             # cross-attn W_o        (e, e)
         w1],                                 # FFN W1                (e, d_ff)
        axis=1).astype(jnp.float32)           # -> (e, 8e + d_ff)

    # Packed bias / LayerNorm / additive-mask buffer (single lane-dense DMA).
    rows = 13 + 2 * s
    rows = ((rows + 7) // 8) * 8
    vec = jnp.zeros((rows, 128), jnp.float32)
    vec = vec.at[0, :3 * e].set(jnp.concatenate([sa_b[0] * scale, sa_b[1], sa_b[2]]))
    vec = vec.at[1, :e].set(sa_b[3])
    vec = vec.at[2, :e].set(ca_b[0] * scale)
    vec = vec.at[3, :2 * e].set(jnp.concatenate([ca_b[1], ca_b[2]]))
    vec = vec.at[4, :e].set(ca_b[3])
    vec = vec.at[5, :d_ff].set(b1.reshape(-1))
    vec = vec.at[6, :e].set(b2.reshape(-1))
    vec = vec.at[7:10, :e].set(ln_g)
    vec = vec.at[10:13, :e].set(ln_b)
    # additive attention masks (mask==0 => -1e9), hoisted out of the kernel
    vec = vec.at[13:13 + s, :s].set(jnp.where(tgt_mask == 0.0, -1e9, 0.0))
    vec = vec.at[13 + s:13 + 2 * s, :s_enc].set(jnp.where(src_mask == 0.0, -1e9, 0.0))

    # Activations flattened in the wrapper (free XLA reshape), x ++ enc in one slab.
    act = jnp.concatenate([x.reshape(b * s, e), enc.reshape(b * s_enc, e)],
                          axis=0).astype(jnp.float32)

    kernel = _make_kernel(b, s, s_enc, e, n_head, d_ff)
    vmem = pl.BlockSpec(memory_space=pltpu.MemorySpace.VMEM)

    # Grid-less call: everything fits in VMEM, single step, no pipelining,
    # no multi-core split (per-core work is far below the fixed overhead).
    out_flat = pl.pallas_call(
        kernel,
        out_shape=jax.ShapeDtypeStruct((b * s, e), jnp.float32),
        in_specs=[vmem, vmem, vmem, vmem],
        out_specs=vmem,
    )(act, w_slab, w2.astype(jnp.float32), vec)

    return out_flat.reshape(b, s, e)


# ---------------------------------------------------------------------------
# pure-JAX reference (mirrors the PyTorch module, uses the UNPACKED params so
# the wrapper's fusion/packing logic is also validated)
# ---------------------------------------------------------------------------
def _ref_layer_norm(h, g, b):
    mu = jnp.mean(h, axis=-1, keepdims=True)
    var = jnp.mean((h - mu) ** 2, axis=-1, keepdims=True)
    return (h - mu) / jnp.sqrt(var + EPS) * g + b


def _ref_mha(q_in, kv_in, w, bias, mask):
    q = q_in @ w[0] + bias[0]
    k = kv_in @ w[1] + bias[1]
    v = kv_in @ w[2] + bias[2]

    def split(t):
        bt, st, _ = t.shape
        return t.reshape(bt, st, N_HEAD, D_K).transpose(0, 2, 1, 3)

    qh, kh, vh = split(q), split(k), split(v)
    scores = jnp.einsum('bhqd,bhkd->bhqk', qh, kh) / math.sqrt(D_K)
    scores = jnp.where(mask[None, None] == 0.0, -1e9, scores)
    probs = jax.nn.softmax(scores, axis=-1)
    ctx = jnp.einsum('bhqk,bhkd->bhqd', probs, vh)
    bt, _, st, _ = ctx.shape
    merged = ctx.transpose(0, 2, 1, 3).reshape(bt, st, EMB)
    return merged @ w[3] + bias[3]


def decoder_layer_ref(x, enc, tgt_mask, src_mask, params):
    sa_w, sa_b, ca_w, ca_b, w1, b1, w2, b2, ln_g, ln_b = params
    a = _ref_mha(x, x, sa_w, sa_b, tgt_mask)
    x1 = _ref_layer_norm(x + a, ln_g[0], ln_b[0])
    a2 = _ref_mha(x1, enc, ca_w, ca_b, src_mask)
    x2 = _ref_layer_norm(x1 + a2, ln_g[1], ln_b[1])
    h = jax.nn.relu(x2 @ w1 + b1)
    ff = h @ w2 + b2
    return _ref_layer_norm(x2 + ff, ln_g[2], ln_b[2])


if __name__ == "__main__":
    key = jax.random.PRNGKey(0)
    ks = jax.random.split(key, 12)

    # deterministic synthetic parameters
    sa_w = 0.1 * jax.random.normal(ks[0], (4, EMB, EMB), jnp.float32)
    sa_b = 0.1 * jax.random.normal(ks[1], (4, EMB), jnp.float32)
    ca_w = 0.1 * jax.random.normal(ks[2], (4, EMB, EMB), jnp.float32)
    ca_b = 0.1 * jax.random.normal(ks[3], (4, EMB), jnp.float32)
    w1 = 0.1 * jax.random.normal(ks[4], (EMB, D_FF), jnp.float32)
    b1 = 0.1 * jax.random.normal(ks[5], (1, D_FF), jnp.float32)
    w2 = 0.1 * jax.random.normal(ks[6], (D_FF, EMB), jnp.float32)
    b2 = 0.1 * jax.random.normal(ks[7], (1, EMB), jnp.float32)
    ln_g = jnp.ones((3, EMB), jnp.float32) + 0.05 * jax.random.normal(ks[8], (3, EMB), jnp.float32)
    ln_b = 0.05 * jax.random.normal(ks[9], (3, EMB), jnp.float32)
    params = (sa_w, sa_b, ca_w, ca_b, w1, b1, w2, b2, ln_g, ln_b)

    # inputs
    x = jax.random.normal(ks[10], (B, S, EMB), jnp.float32)
    enc_out = jax.random.normal(ks[11], (B, S_ENC, EMB), jnp.float32)
    tgt_mask = jnp.tril(jnp.ones((S, S), jnp.float32))        # causal decoder mask
    src_mask = jnp.ones((S, S_ENC), jnp.float32)              # no source padding

    out = decoder_layer(x, enc_out, tgt_mask, src_mask, params)
    out = jax.block_until_ready(out)

    ref = jax.block_until_ready(decoder_layer_ref(x, enc_out, tgt_mask, src_mask, params))
    np.testing.assert_allclose(np.asarray(out), np.asarray(ref), rtol=1e-2, atol=1e-2)

    print("KERNEL_OK")
</pallas_src>

<mosaic_0001>
module attributes {stable_mosaic.version = 11 : i64} {
  func.func @kernel(%arg0: memref<32x32xf32, #tpu.memory_space<vmem>>, %arg1: memref<32x320xf32, #tpu.memory_space<vmem>>, %arg2: memref<64x32xf32, #tpu.memory_space<vmem>>, %arg3: memref<32x128xf32, #tpu.memory_space<vmem>>, %arg4: memref<16x32xf32, #tpu.memory_space<vmem>>) attributes {dimension_semantics = [], scalar_prefetch = 0 : i64, scratch_operands = 0 : i64, tpu.core_type = #tpu.core_type<tc>} {
    %c0 = arith.constant 0 : index
    %c0_0 = arith.constant 0 : index
    %0 = vector.load %arg0[%c0, %c0_0] : memref<32x32xf32, #tpu.memory_space<vmem>>, vector<16x32xf32>
    %c16 = arith.constant 16 : index
    %c0_1 = arith.constant 0 : index
    %1 = vector.load %arg0[%c16, %c0_1] : memref<32x32xf32, #tpu.memory_space<vmem>>, vector<16x32xf32>
    %c0_2 = arith.constant 0 : index
    %c0_3 = arith.constant 0 : index
    %2 = vector.load %arg1[%c0_2, %c0_3] : memref<32x320xf32, #tpu.memory_space<vmem>>, vector<32x320xf32>
    %3 = vector.extract_strided_slice %2 {offsets = [0, 0], sizes = [32, 96], strides = [1, 1]} : vector<32x320xf32> to vector<32x96xf32>
    %4 = vector.extract_strided_slice %2 {offsets = [0, 96], sizes = [32, 32], strides = [1, 1]} : vector<32x320xf32> to vector<32x32xf32>
    %5 = vector.extract_strided_slice %2 {offsets = [0, 128], sizes = [32, 32], strides = [1, 1]} : vector<32x320xf32> to vector<32x32xf32>
    %6 = vector.extract_strided_slice %2 {offsets = [0, 160], sizes = [32, 64], strides = [1, 1]} : vector<32x320xf32> to vector<32x64xf32>
    %7 = vector.extract_strided_slice %2 {offsets = [0, 224], sizes = [32, 32], strides = [1, 1]} : vector<32x320xf32> to vector<32x32xf32>
    %8 = vector.extract_strided_slice %2 {offsets = [0, 256], sizes = [32, 64], strides = [1, 1]} : vector<32x320xf32> to vector<32x64xf32>
    %c0_4 = arith.constant 0 : index
    %c0_5 = arith.constant 0 : index
    %9 = vector.load %arg3[%c0_4, %c0_5] : memref<32x128xf32, #tpu.memory_space<vmem>>, vector<32x128xf32>
    %10 = vector.extract_strided_slice %9 {offsets = [0, 0], sizes = [1, 96], strides = [1, 1]} : vector<32x128xf32> to vector<1x96xf32>
    %11 = vector.extract_strided_slice %9 {offsets = [1, 0], sizes = [1, 32], strides = [1, 1]} : vector<32x128xf32> to vector<1x32xf32>
    %12 = vector.extract_strided_slice %9 {offsets = [2, 0], sizes = [1, 32], strides = [1, 1]} : vector<32x128xf32> to vector<1x32xf32>
    %13 = vector.extract_strided_slice %9 {offsets = [3, 0], sizes = [1, 64], strides = [1, 1]} : vector<32x128xf32> to vector<1x64xf32>
    %14 = vector.extract_strided_slice %9 {offsets = [4, 0], sizes = [1, 32], strides = [1, 1]} : vector<32x128xf32> to vector<1x32xf32>
    %15 = vector.extract_strided_slice %9 {offsets = [5, 0], sizes = [1, 64], strides = [1, 1]} : vector<32x128xf32> to vector<1x64xf32>
    %16 = vector.extract_strided_slice %9 {offsets = [6, 0], sizes = [1, 32], strides = [1, 1]} : vector<32x128xf32> to vector<1x32xf32>
    %17 = vector.extract_strided_slice %9 {offsets = [7, 0], sizes = [3, 32], strides = [1, 1]} : vector<32x128xf32> to vector<3x32xf32>
    %18 = vector.extract_strided_slice %9 {offsets = [10, 0], sizes = [3, 32], strides = [1, 1]} : vector<32x128xf32> to vector<3x32xf32>
    %19 = vector.extract_strided_slice %9 {offsets = [13, 0], sizes = [8, 8], strides = [1, 1]} : vector<32x128xf32> to vector<8x8xf32>
    %20 = vector.extract_strided_slice %9 {offsets = [21, 0], sizes = [8, 8], strides = [1, 1]} : vector<32x128xf32> to vector<8x8xf32>
    %cst = arith.constant dense<0.000000e+00> : vector<16x96xf32>
    %21 = tpu.matmul %0, %3, %cst {dimension_numbers = #tpu.dot_dimension_numbers<[1], [0], [0], [1], [0, 0, 1, 1], [], []>} : vector<16x32xf32>, vector<32x96xf32>, vector<16x96xf32> -> vector<16x96xf32>
    %22 = vector.broadcast %10 : vector<1x96xf32> to vector<16x96xf32>
    %23 = arith.addf %21, %22 : vector<16x96xf32>
    %24 = vector.extract_strided_slice %23 {offsets = [0, 0], sizes = [16, 32], strides = [1, 1]} : vector<16x96xf32> to vector<16x32xf32>
    %25 = vector.extract_strided_slice %23 {offsets = [0, 32], sizes = [16, 32], strides = [1, 1]} : vector<16x96xf32> to vector<16x32xf32>
    %26 = vector.extract_strided_slice %23 {offsets = [0, 64], sizes = [16, 32], strides = [1, 1]} : vector<16x96xf32> to vector<16x32xf32>
    %27 = vector.extract_strided_slice %24 {offsets = [0, 0], sizes = [16, 8], strides = [1, 1]} : vector<16x32xf32> to vector<16x8xf32>
    %28 = vector.shape_cast %27 : vector<16x8xf32> to vector<2x8x8xf32>
    %29 = vector.extract_strided_slice %24 {offsets = [0, 8], sizes = [16, 8], strides = [1, 1]} : vector<16x32xf32> to vector<16x8xf32>
    %30 = vector.shape_cast %29 : vector<16x8xf32> to vector<2x8x8xf32>
    %31 = vector.extract_strided_slice %24 {offsets = [0, 16], sizes = [16, 8], strides = [1, 1]} : vector<16x32xf32> to vector<16x8xf32>
    %32 = vector.shape_cast %31 : vector<16x8xf32> to vector<2x8x8xf32>
    %33 = vector.extract_strided_slice %24 {offsets = [0, 24], sizes = [16, 8], strides = [1, 1]} : vector<16x32xf32> to vector<16x8xf32>
    %34 = vector.shape_cast %33 : vector<16x8xf32> to vector<2x8x8xf32>
    %35 = tpu.concatenate %28, %30, %32, %34 in 0 : vector<2x8x8xf32>, vector<2x8x8xf32>, vector<2x8x8xf32>, vector<2x8x8xf32> -> vector<8x8x8xf32>
    %36 = vector.extract_strided_slice %25 {offsets = [0, 0], sizes = [16, 8], strides = [1, 1]} : vector<16x32xf32> to vector<16x8xf32>
    %37 = vector.shape_cast %36 : vector<16x8xf32> to vector<2x8x8xf32>
    %38 = vector.extract_strided_slice %25 {offsets = [0, 8], sizes = [16, 8], strides = [1, 1]} : vector<16x32xf32> to vector<16x8xf32>
    %39 = vector.shape_cast %38 : vector<16x8xf32> to vector<2x8x8xf32>
    %40 = vector.extract_strided_slice %25 {offsets = [0, 16], sizes = [16, 8], strides = [1, 1]} : vector<16x32xf32> to vector<16x8xf32>
    %41 = vector.shape_cast %40 : vector<16x8xf32> to vector<2x8x8xf32>
    %42 = vector.extract_strided_slice %25 {offsets = [0, 24], sizes = [16, 8], strides = [1, 1]} : vector<16x32xf32> to vector<16x8xf32>
    %43 = vector.shape_cast %42 : vector<16x8xf32> to vector<2x8x8xf32>
    %44 = tpu.concatenate %37, %39, %41, %43 in 0 : vector<2x8x8xf32>, vector<2x8x8xf32>, vector<2x8x8xf32>, vector<2x8x8xf32> -> vector<8x8x8xf32>
    %45 = vector.extract_strided_slice %26 {offsets = [0, 0], sizes = [16, 8], strides = [1, 1]} : vector<16x32xf32> to vector<16x8xf32>
    %46 = vector.shape_cast %45 : vector<16x8xf32> to vector<2x8x8xf32>
    %47 = vector.extract_strided_slice %26 {offsets = [0, 8], sizes = [16, 8], strides = [1, 1]} : vector<16x32xf32> to vector<16x8xf32>
    %48 = vector.shape_cast %47 : vector<16x8xf32> to vector<2x8x8xf32>
    %49 = vector.extract_strided_slice %26 {offsets = [0, 16], sizes = [16, 8], strides = [1, 1]} : vector<16x32xf32> to vector<16x8xf32>
    %50 = vector.shape_cast %49 : vector<16x8xf32> to vector<2x8x8xf32>
    %51 = vector.extract_strided_slice %26 {offsets = [0, 24], sizes = [16, 8], strides = [1, 1]} : vector<16x32xf32> to vector<16x8xf32>
    %52 = vector.shape_cast %51 : vector<16x8xf32> to vector<2x8x8xf32>
    %53 = tpu.concatenate %46, %48, %50, %52 in 0 : vector<2x8x8xf32>, vector<2x8x8xf32>, vector<2x8x8xf32>, vector<2x8x8xf32> -> vector<8x8x8xf32>
    "tpu.trace_start"() <{level = 10 : i32, message = "bqd,bkd->bqk"}> : () -> ()
    %cst_6 = arith.constant dense<0.000000e+00> : vector<8x8x8xf32>
    %54 = tpu.matmul %35, %44, %cst_6 {dimension_numbers = #tpu.dot_dimension_numbers<[2], [2], [1], [1], [0, 0, 0, 1, 1, 1], [0], [0]>} : vector<8x8x8xf32>, vector<8x8x8xf32>, vector<8x8x8xf32> -> vector<8x8x8xf32>
    "tpu.trace_stop"() : () -> ()
    %55 = vector.shape_cast %19 : vector<8x8xf32> to vector<1x8x8xf32>
    %56 = vector.broadcast %55 : vector<1x8x8xf32> to vector<8x8x8xf32>
    %57 = arith.addf %54, %56 : vector<8x8x8xf32>
    %cst_7 = arith.constant dense<0xFF800000> : vector<8x8xf32>
    %58 = vector.multi_reduction <maximumf>, %57, %cst_7 [2] : vector<8x8x8xf32> to vector<8x8xf32>
    %59 = vector.shape_cast %58 : vector<8x8xf32> to vector<8x8x1xf32>
    %60 = vector.broadcast %59 : vector<8x8x1xf32> to vector<8x8x8xf32>
    %61 = arith.subf %57, %60 : vector<8x8x8xf32>
    %62 = math.exp %61 : vector<8x8x8xf32>
    %cst_8 = arith.constant dense<0.000000e+00> : vector<8x8xf32>
    %63 = vector.multi_reduction <add>, %62, %cst_8 [2] : vector<8x8x8xf32> to vector<8x8xf32>
    %64 = vector.shape_cast %63 : vector<8x8xf32> to vector<8x8x1xf32>
    %65 = tpu.reciprocal %64 {approx = true} : vector<8x8x1xf32> -> vector<8x8x1xf32>
    %66 = vector.broadcast %65 : vector<8x8x1xf32> to vector<8x8x8xf32>
    %67 = arith.mulf %62, %66 : vector<8x8x8xf32>
    "tpu.trace_start"() <{level = 10 : i32, message = "bqk,bkd->bqd"}> : () -> ()
    %cst_9 = arith.constant dense<0.000000e+00> : vector<8x8x8xf32>
    %68 = tpu.matmul %67, %53, %cst_9 {dimension_numbers = #tpu.dot_dimension_numbers<[2], [1], [1], [2], [0, 0, 0, 1, 1, 2], [0], [0]>} : vector<8x8x8xf32>, vector<8x8x8xf32>, vector<8x8x8xf32> -> vector<8x8x8xf32>
    "tpu.trace_stop"() : () -> ()
    %69 = vector.extract_strided_slice %68 {offsets = [0, 0, 0], sizes = [2, 8, 8], strides = [1, 1, 1]} : vector<8x8x8xf32> to vector<2x8x8xf32>
    %70 = vector.shape_cast %69 : vector<2x8x8xf32> to vector<16x8xf32>
    %71 = vector.extract_strided_slice %68 {offsets = [2, 0, 0], sizes = [2, 8, 8], strides = [1, 1, 1]} : vector<8x8x8xf32> to vector<2x8x8xf32>
    %72 = vector.shape_cast %71 : vector<2x8x8xf32> to vector<16x8xf32>
    %73 = vector.extract_strided_slice %68 {offsets = [4, 0, 0], sizes = [2, 8, 8], strides = [1, 1, 1]} : vector<8x8x8xf32> to vector<2x8x8xf32>
    %74 = vector.shape_cast %73 : vector<2x8x8xf32> to vector<16x8xf32>
    %75 = vector.extract_strided_slice %68 {offsets = [6, 0, 0], sizes = [2, 8, 8], strides = [1, 1, 1]} : vector<8x8x8xf32> to vector<2x8x8xf32>
    %76 = vector.shape_cast %75 : vector<2x8x8xf32> to vector<16x8xf32>
    %77 = tpu.concatenate %70, %72, %74, %76 in 1 : vector<16x8xf32>, vector<16x8xf32>, vector<16x8xf32>, vector<16x8xf32> -> vector<16x32xf32>
    %cst_10 = arith.constant dense<0.000000e+00> : vector<16x32xf32>
    %78 = tpu.matmul %77, %4, %cst_10 {dimension_numbers = #tpu.dot_dimension_numbers<[1], [0], [0], [1], [0, 0, 1, 1], [], []>} : vector<16x32xf32>, vector<32x32xf32>, vector<16x32xf32> -> vector<16x32xf32>
    %79 = vector.broadcast %11 : vector<1x32xf32> to vector<16x32xf32>
    %80 = arith.addf %78, %79 : vector<16x32xf32>
    %81 = arith.addf %0, %80 : vector<16x32xf32>
    %82 = vector.extract_strided_slice %17 {offsets = [0, 0], sizes = [1, 32], strides = [1, 1]} : vector<3x32xf32> to vector<1x32xf32>
    %83 = vector.extract_strided_slice %18 {offsets = [0, 0], sizes = [1, 32], strides = [1, 1]} : vector<3x32xf32> to vector<1x32xf32>
    %cst_11 = arith.constant dense<0.000000e+00> : vector<16xf32>
    %84 = vector.multi_reduction <add>, %81, %cst_11 [1] : vector<16x32xf32> to vector<16xf32>
    %85 = vector.shape_cast %84 : vector<16xf32> to vector<16x1xf32>
    %cst_12 = arith.constant 3.200000e+01 : f32
    %86 = vector.broadcast %cst_12 : f32 to vector<16x1xf32>
    %87 = arith.divf %85, %86 : vector<16x1xf32>
    %88 = vector.broadcast %87 : vector<16x1xf32> to vector<16x32xf32>
    %89 = arith.subf %81, %88 : vector<16x32xf32>
    %90 = arith.mulf %89, %89 : vector<16x32xf32>
    %cst_13 = arith.constant dense<0.000000e+00> : vector<16xf32>
    %91 = vector.multi_reduction <add>, %90, %cst_13 [1] : vector<16x32xf32> to vector<16xf32>
    %92 = vector.shape_cast %91 : vector<16xf32> to vector<16x1xf32>
    %cst_14 = arith.constant 3.200000e+01 : f32
    %93 = vector.broadcast %cst_14 : f32 to vector<16x1xf32>
    %94 = arith.divf %92, %93 : vector<16x1xf32>
    %95 = vector.broadcast %87 : vector<16x1xf32> to vector<16x32xf32>
    %96 = arith.subf %81, %95 : vector<16x32xf32>
    %cst_15 = arith.constant 9.99999974E-6 : f32
    %97 = vector.broadcast %cst_15 : f32 to vector<16x1xf32>
    %98 = arith.addf %94, %97 : vector<16x1xf32>
    %99 = math.rsqrt %98 : vector<16x1xf32>
    %100 = vector.broadcast %99 : vector<16x1xf32> to vector<16x32xf32>
    %101 = arith.mulf %96, %100 : vector<16x32xf32>
    %102 = vector.broadcast %82 : vector<1x32xf32> to vector<16x32xf32>
    %103 = arith.mulf %101, %102 : vector<16x32xf32>
    %104 = vector.broadcast %83 : vector<1x32xf32> to vector<16x32xf32>
    %105 = arith.addf %103, %104 : vector<16x32xf32>
    %cst_16 = arith.constant dense<0.000000e+00> : vector<16x32xf32>
    %106 = tpu.matmul %105, %5, %cst_16 {dimension_numbers = #tpu.dot_dimension_numbers<[1], [0], [0], [1], [0, 0, 1, 1], [], []>} : vector<16x32xf32>, vector<32x32xf32>, vector<16x32xf32> -> vector<16x32xf32>
    %107 = vector.broadcast %12 : vector<1x32xf32> to vector<16x32xf32>
    %108 = arith.addf %106, %107 : vector<16x32xf32>
    %cst_17 = arith.constant dense<0.000000e+00> : vector<16x64xf32>
    %109 = tpu.matmul %1, %6, %cst_17 {dimension_numbers = #tpu.dot_dimension_numbers<[1], [0], [0], [1], [0, 0, 1, 1], [], []>} : vector<16x32xf32>, vector<32x64xf32>, vector<16x64xf32> -> vector<16x64xf32>
    %110 = vector.broadcast %13 : vector<1x64xf32> to vector<16x64xf32>
    %111 = arith.addf %109, %110 : vector<16x64xf32>
    %112 = vector.extract_strided_slice %111 {offsets = [0, 0], sizes = [16, 32], strides = [1, 1]} : vector<16x64xf32> to vector<16x32xf32>
    %113 = vector.extract_strided_slice %111 {offsets = [0, 32], sizes = [16, 32], strides = [1, 1]} : vector<16x64xf32> to vector<16x32xf32>
    %114 = vector.extract_strided_slice %108 {offsets = [0, 0], sizes = [16, 8], strides = [1, 1]} : vector<16x32xf32> to vector<16x8xf32>
    %115 = vector.shape_cast %114 : vector<16x8xf32> to vector<2x8x8xf32>
    %116 = vector.extract_strided_slice %108 {offsets = [0, 8], sizes = [16, 8], strides = [1, 1]} : vector<16x32xf32> to vector<16x8xf32>
    %117 = vector.shape_cast %116 : vector<16x8xf32> to vector<2x8x8xf32>
    %118 = vector.extract_strided_slice %108 {offsets = [0, 16], sizes = [16, 8], strides = [1, 1]} : vector<16x32xf32> to vector<16x8xf32>
    %119 = vector.shape_cast %118 : vector<16x8xf32> to vector<2x8x8xf32>
    %120 = vector.extract_strided_slice %108 {offsets = [0, 24], sizes = [16, 8], strides = [1, 1]} : vector<16x32xf32> to vector<16x8xf32>
    %121 = vector.shape_cast %120 : vector<16x8xf32> to vector<2x8x8xf32>
    %122 = tpu.concatenate %115, %117, %119, %121 in 0 : vector<2x8x8xf32>, vector<2x8x8xf32>, vector<2x8x8xf32>, vector<2x8x8xf32> -> vector<8x8x8xf32>
    %123 = vector.extract_strided_slice %112 {offsets = [0, 0], sizes = [16, 8], strides = [1, 1]} : vector<16x32xf32> to vector<16x8xf32>
    %124 = vector.shape_cast %123 : vector<16x8xf32> to vector<2x8x8xf32>
    %125 = vector.extract_strided_slice %112 {offsets = [0, 8], sizes = [16, 8], strides = [1, 1]} : vector<16x32xf32> to vector<16x8xf32>
    %126 = vector.shape_cast %125 : vector<16x8xf32> to vector<2x8x8xf32>
    %127 = vector.extract_strided_slice %112 {offsets = [0, 16], sizes = [16, 8], strides = [1, 1]} : vector<16x32xf32> to vector<16x8xf32>
    %128 = vector.shape_cast %127 : vector<16x8xf32> to vector<2x8x8xf32>
    %129 = vector.extract_strided_slice %112 {offsets = [0, 24], sizes = [16, 8], strides = [1, 1]} : vector<16x32xf32> to vector<16x8xf32>
    %130 = vector.shape_cast %129 : vector<16x8xf32> to vector<2x8x8xf32>
    %131 = tpu.concatenate %124, %126, %128, %130 in 0 : vector<2x8x8xf32>, vector<2x8x8xf32>, vector<2x8x8xf32>, vector<2x8x8xf32> -> vector<8x8x8xf32>
    %132 = vector.extract_strided_slice %113 {offsets = [0, 0], sizes = [16, 8], strides = [1, 1]} : vector<16x32xf32> to vector<16x8xf32>
    %133 = vector.shape_cast %132 : vector<16x8xf32> to vector<2x8x8xf32>
    %134 = vector.extract_strided_slice %113 {offsets = [0, 8], sizes = [16, 8], strides = [1, 1]} : vector<16x32xf32> to vector<16x8xf32>
    %135 = vector.shape_cast %134 : vector<16x8xf32> to vector<2x8x8xf32>
    %136 = vector.extract_strided_slice %113 {offsets = [0, 16], sizes = [16, 8], strides = [1, 1]} : vector<16x32xf32> to vector<16x8xf32>
    %137 = vector.shape_cast %136 : vector<16x8xf32> to vector<2x8x8xf32>
    %138 = vector.extract_strided_slice %113 {offsets = [0, 24], sizes = [16, 8], strides = [1, 1]} : vector<16x32xf32> to vector<16x8xf32>
    %139 = vector.shape_cast %138 : vector<16x8xf32> to vector<2x8x8xf32>
    %140 = tpu.concatenate %133, %135, %137, %139 in 0 : vector<2x8x8xf32>, vector<2x8x8xf32>, vector<2x8x8xf32>, vector<2x8x8xf32> -> vector<8x8x8xf32>
    "tpu.trace_start"() <{level = 10 : i32, message = "bqd,bkd->bqk"}> : () -> ()
    %cst_18 = arith.constant dense<0.000000e+00> : vector<8x8x8xf32>
    %141 = tpu.matmul %122, %131, %cst_18 {dimension_numbers = #tpu.dot_dimension_numbers<[2], [2], [1], [1], [0, 0, 0, 1, 1, 1], [0], [0]>} : vector<8x8x8xf32>, vector<8x8x8xf32>, vector<8x8x8xf32> -> vector<8x8x8xf32>
    "tpu.trace_stop"() : () -> ()
    %142 = vector.shape_cast %20 : vector<8x8xf32> to vector<1x8x8xf32>
    %143 = vector.broadcast %142 : vector<1x8x8xf32> to vector<8x8x8xf32>
    %144 = arith.addf %141, %143 : vector<8x8x8xf32>
    %cst_19 = arith.constant dense<0xFF800000> : vector<8x8xf32>
    %145 = vector.multi_reduction <maximumf>, %144, %cst_19 [2] : vector<8x8x8xf32> to vector<8x8xf32>
    %146 = vector.shape_cast %145 : vector<8x8xf32> to vector<8x8x1xf32>
    %147 = vector.broadcast %146 : vector<8x8x1xf32> to vector<8x8x8xf32>
    %148 = arith.subf %144, %147 : vector<8x8x8xf32>
    %149 = math.exp %148 : vector<8x8x8xf32>
    %cst_20 = arith.constant dense<0.000000e+00> : vector<8x8xf32>
    %150 = vector.multi_reduction <add>, %149, %cst_20 [2] : vector<8x8x8xf32> to vector<8x8xf32>
    %151 = vector.shape_cast %150 : vector<8x8xf32> to vector<8x8x1xf32>
    %152 = tpu.reciprocal %151 {approx = true} : vector<8x8x1xf32> -> vector<8x8x1xf32>
    %153 = vector.broadcast %152 : vector<8x8x1xf32> to vector<8x8x8xf32>
    %154 = arith.mulf %149, %153 : vector<8x8x8xf32>
    "tpu.trace_start"() <{level = 10 : i32, message = "bqk,bkd->bqd"}> : () -> ()
    %cst_21 = arith.constant dense<0.000000e+00> : vector<8x8x8xf32>
    %155 = tpu.matmul %154, %140, %cst_21 {dimension_numbers = #tpu.dot_dimension_numbers<[2], [1], [1], [2], [0, 0, 0, 1, 1, 2], [0], [0]>} : vector<8x8x8xf32>, vector<8x8x8xf32>, vector<8x8x8xf32> -> vector<8x8x8xf32>
    "tpu.trace_stop"() : () -> ()
    %156 = vector.extract_strided_slice %155 {offsets = [0, 0, 0], sizes = [2, 8, 8], strides = [1, 1, 1]} : vector<8x8x8xf32> to vector<2x8x8xf32>
    %157 = vector.shape_cast %156 : vector<2x8x8xf32> to vector<16x8xf32>
    %158 = vector.extract_strided_slice %155 {offsets = [2, 0, 0], sizes = [2, 8, 8], strides = [1, 1, 1]} : vector<8x8x8xf32> to vector<2x8x8xf32>
    %159 = vector.shape_cast %158 : vector<2x8x8xf32> to vector<16x8xf32>
    %160 = vector.extract_strided_slice %155 {offsets = [4, 0, 0], sizes = [2, 8, 8], strides = [1, 1, 1]} : vector<8x8x8xf32> to vector<2x8x8xf32>
    %161 = vector.shape_cast %160 : vector<2x8x8xf32> to vector<16x8xf32>
    %162 = vector.extract_strided_slice %155 {offsets = [6, 0, 0], sizes = [2, 8, 8], strides = [1, 1, 1]} : vector<8x8x8xf32> to vector<2x8x8xf32>
    %163 = vector.shape_cast %162 : vector<2x8x8xf32> to vector<16x8xf32>
    %164 = tpu.concatenate %157, %159, %161, %163 in 1 : vector<16x8xf32>, vector<16x8xf32>, vector<16x8xf32>, vector<16x8xf32> -> vector<16x32xf32>
    %cst_22 = arith.constant dense<0.000000e+00> : vector<16x32xf32>
    %165 = tpu.matmul %164, %7, %cst_22 {dimension_numbers = #tpu.dot_dimension_numbers<[1], [0], [0], [1], [0, 0, 1, 1], [], []>} : vector<16x32xf32>, vector<32x32xf32>, vector<16x32xf32> -> vector<16x32xf32>
    %166 = vector.broadcast %14 : vector<1x32xf32> to vector<16x32xf32>
    %167 = arith.addf %165, %166 : vector<16x32xf32>
    %168 = arith.addf %105, %167 : vector<16x32xf32>
    %169 = vector.extract_strided_slice %17 {offsets = [1, 0], sizes = [1, 32], strides = [1, 1]} : vector<3x32xf32> to vector<1x32xf32>
    %170 = vector.extract_strided_slice %18 {offsets = [1, 0], sizes = [1, 32], strides = [1, 1]} : vector<3x32xf32> to vector<1x32xf32>
    %cst_23 = arith.constant dense<0.000000e+00> : vector<16xf32>
    %171 = vector.multi_reduction <add>, %168, %cst_23 [1] : vector<16x32xf32> to vector<16xf32>
    %172 = vector.shape_cast %171 : vector<16xf32> to vector<16x1xf32>
    %cst_24 = arith.constant 3.200000e+01 : f32
    %173 = vector.broadcast %cst_24 : f32 to vector<16x1xf32>
    %174 = arith.divf %172, %173 : vector<16x1xf32>
    %175 = vector.broadcast %174 : vector<16x1xf32> to vector<16x32xf32>
    %176 = arith.subf %168, %175 : vector<16x32xf32>
    %177 = arith.mulf %176, %176 : vector<16x32xf32>
    %cst_25 = arith.constant dense<0.000000e+00> : vector<16xf32>
    %178 = vector.multi_reduction <add>, %177, %cst_25 [1] : vector<16x32xf32> to vector<16xf32>
    %179 = vector.shape_cast %178 : vector<16xf32> to vector<16x1xf32>
    %cst_26 = arith.constant 3.200000e+01 : f32
    %180 = vector.broadcast %cst_26 : f32 to vector<16x1xf32>
    %181 = arith.divf %179, %180 : vector<16x1xf32>
    %182 = vector.broadcast %174 : vector<16x1xf32> to vector<16x32xf32>
    %183 = arith.subf %168, %182 : vector<16x32xf32>
    %cst_27 = arith.constant 9.99999974E-6 : f32
    %184 = vector.broadcast %cst_27 : f32 to vector<16x1xf32>
    %185 = arith.addf %181, %184 : vector<16x1xf32>
    %186 = math.rsqrt %185 : vector<16x1xf32>
    %187 = vector.broadcast %186 : vector<16x1xf32> to vector<16x32xf32>
    %188 = arith.mulf %183, %187 : vector<16x32xf32>
    %189 = vector.broadcast %169 : vector<1x32xf32> to vector<16x32xf32>
    %190 = arith.mulf %188, %189 : vector<16x32xf32>
    %191 = vector.broadcast %170 : vector<1x32xf32> to vector<16x32xf32>
    %192 = arith.addf %190, %191 : vector<16x32xf32>
    %cst_28 = arith.constant dense<0.000000e+00> : vector<16x64xf32>
    %193 = tpu.matmul %192, %8, %cst_28 {dimension_numbers = #tpu.dot_dimension_numbers<[1], [0], [0], [1], [0, 0, 1, 1], [], []>} : vector<16x32xf32>, vector<32x64xf32>, vector<16x64xf32> -> vector<16x64xf32>
    %194 = vector.broadcast %15 : vector<1x64xf32> to vector<16x64xf32>
    %195 = arith.addf %193, %194 : vector<16x64xf32>
    %cst_29 = arith.constant 0.000000e+00 : f32
    %196 = vector.broadcast %cst_29 : f32 to vector<16x64xf32>
    %197 = arith.maximumf %195, %196 : vector<16x64xf32>
    %c0_30 = arith.constant 0 : index
    %c0_31 = arith.constant 0 : index
    %198 = vector.load %arg2[%c0_30, %c0_31] : memref<64x32xf32, #tpu.memory_space<vmem>>, vector<64x32xf32>
    %cst_32 = arith.constant dense<0.000000e+00> : vector<16x32xf32>
    %199 = tpu.matmul %197, %198, %cst_32 {dimension_numbers = #tpu.dot_dimension_numbers<[1], [0], [0], [1], [0, 0, 1, 1], [], []>} : vector<16x64xf32>, vector<64x32xf32>, vector<16x32xf32> -> vector<16x32xf32>
    %200 = vector.broadcast %16 : vector<1x32xf32> to vector<16x32xf32>
    %201 = arith.addf %199, %200 : vector<16x32xf32>
    %202 = arith.addf %192, %201 : vector<16x32xf32>
    %203 = vector.extract_strided_slice %17 {offsets = [2, 0], sizes = [1, 32], strides = [1, 1]} : vector<3x32xf32> to vector<1x32xf32>
    %204 = vector.extract_strided_slice %18 {offsets = [2, 0], sizes = [1, 32], strides = [1, 1]} : vector<3x32xf32> to vector<1x32xf32>
    %cst_33 = arith.constant dense<0.000000e+00> : vector<16xf32>
    %205 = vector.multi_reduction <add>, %202, %cst_33 [1] : vector<16x32xf32> to vector<16xf32>
    %206 = vector.shape_cast %205 : vector<16xf32> to vector<16x1xf32>
    %cst_34 = arith.constant 3.200000e+01 : f32
    %207 = vector.broadcast %cst_34 : f32 to vector<16x1xf32>
    %208 = arith.divf %206, %207 : vector<16x1xf32>
    %209 = vector.broadcast %208 : vector<16x1xf32> to vector<16x32xf32>
    %210 = arith.subf %202, %209 : vector<16x32xf32>
    %211 = arith.mulf %210, %210 : vector<16x32xf32>
    %cst_35 = arith.constant dense<0.000000e+00> : vector<16xf32>
    %212 = vector.multi_reduction <add>, %211, %cst_35 [1] : vector<16x32xf32> to vector<16xf32>
    %213 = vector.shape_cast %212 : vector<16xf32> to vector<16x1xf32>
    %cst_36 = arith.constant 3.200000e+01 : f32
    %214 = vector.broadcast %cst_36 : f32 to vector<16x1xf32>
    %215 = arith.divf %213, %214 : vector<16x1xf32>
    %216 = vector.broadcast %208 : vector<16x1xf32> to vector<16x32xf32>
    %217 = arith.subf %202, %216 : vector<16x32xf32>
    %cst_37 = arith.constant 9.99999974E-6 : f32
    %218 = vector.broadcast %cst_37 : f32 to vector<16x1xf32>
    %219 = arith.addf %215, %218 : vector<16x1xf32>
    %220 = math.rsqrt %219 : vector<16x1xf32>
    %221 = vector.broadcast %220 : vector<16x1xf32> to vector<16x32xf32>
    %222 = arith.mulf %217, %221 : vector<16x32xf32>
    %223 = vector.broadcast %203 : vector<1x32xf32> to vector<16x32xf32>
    %224 = arith.mulf %222, %223 : vector<16x32xf32>
    %225 = vector.broadcast %204 : vector<1x32xf32> to vector<16x32xf32>
    %226 = arith.addf %224, %225 : vector<16x32xf32>
    %c0_38 = arith.constant 0 : index
    %c0_39 = arith.constant 0 : index
    %227 = vector.load %arg4[%c0_38, %c0_39] : memref<16x32xf32, #tpu.memory_space<vmem>>, vector<16x32xf32>
    tpu.vector_store %arg4[%c0_38, %c0_39], %226 {strides = array<i32>} : memref<16x32xf32, #tpu.memory_space<vmem>>, vector<16x32xf32>,
    return
  }
}

</mosaic_0001>

<bundles_post_ra>
// kernel: tpu_custom_call.1
= control target key start
LH: loop header
LB: loop body
LE: loop exit
PB: predicated region body
PF: predicated region fallthrough
CT: control target
= control target key end

     0   :  { %9 = vsyncpa [#allocation3], 0  ;;  %s4781_s0 = inlined_call_operand.hbm [shape: f32[32,32], index: 0, kind: input, shape index: {}]   ;;  %s4782_s1 = inlined_call_operand.vmem [shape: f32[32,320], index: 1, kind: input, shape index: {}]   ;;  %s4783_s2 = inlined_call_operand.vmem [shape: f32[64,32], index: 2, kind: input, shape index: {}]   ;;  %s4784_s3 = inlined_call_operand.hbm [shape: f32[32,128], index: 3, kind: input, shape index: {}]   ;;  %s4785_s4 = inlined_call_operand.hbm [shape: f32[16,32], index: 4, kind: output, shape index: {}]  }
   0x1   :  { %10 = vsyncpa [#allocation6], 0 }
   0x2   :  { %11 = vsyncpa [#allocation4], 0  ;;  %s4142_s15 = smov [#allocation2]  }
   0x3   :  { %s17_s16 = sshll.u32 %s4142_s15, 4  ;;  %s18_s16 = int_to_ptr.vmem [resolvable:$true] %s17_s16 }
   0x4   :  { %s4084_s17 = scalar_lea.vmem %s18_s16, 512  ;;  %p4089_p1 = scmp.lt.s32.totalorder %s18_s16, %s18_s16 }
   0x5   :  { %p4085_p0 = scmp.ne.s32.totalorder %s18_s16, %s4084_s17  ;;  %p4090_p2 = scmp.lt.s32.totalorder %s4084_s17, %s4084_s17 }
   0x7   :  { %p4091_p3 = por %p4090_p2, %p4089_p1 }
   0x9   :  { %p4092_p4 = pnand %p4091_p3, %p4085_p0 }
   0xb   :  { %4095 = shalt.err (!%p4092_p4)
}
   0xc   :  { %s4143_s18 = smov 128   ;;  %s4144_s19 = smov 8  }
   0xd   :  { %23 = dma.hbm_to_vmem [thread:$0]  %s4781_s0, 512, %s18_s16, [#allocation3], %s4143_s18, %s4143_s18, %s4144_s19  }
   0xe   :  { %s4145_s22 = smov [#allocation5]  }
   0xf   :  { %s33_s23 = sshll.u32 %s4145_s22, 4  ;;  %s34_s23 = int_to_ptr.vmem [resolvable:$true] %s33_s23 }
  0x10   :  { %s4104_s24 = scalar_lea.vmem %s34_s23, 512  ;;  %p4109_p6 = scmp.lt.s32.totalorder %s34_s23, %s34_s23 }
  0x11   :  { %p4105_p5 = scmp.ne.s32.totalorder %s34_s23, %s4104_s24  ;;  %p4110_p7 = scmp.lt.s32.totalorder %s4104_s24, %s4104_s24 }
  0x13   :  { %p4111_p8 = por %p4110_p7, %p4109_p6 }
  0x15   :  { %p4112_p9 = pnand %p4111_p8, %p4105_p5 }
  0x17   :  { %4115 = shalt.err (!%p4112_p9)
}
  0x18   :  { %39 = dma.hbm_to_vmem [thread:$0]  %s4784_s3, 512, %s34_s23, [#allocation6], %s4143_s18, %s4143_s18, %s4144_s19  }
  0x19   :  { %4136 = dma.done.wait [#allocation3], 512  }
  0x1a   :  { %4137 = vsyncadd [#allocation3], 4294966784 }
  0x1b   :  { %4138 = dma.done.wait [#allocation6], 512  }
  0x1c   :  { %4139 = vsyncadd [#allocation6], 4294966784  ;;  %vm70_vm0 = vcmask 261120   ;;  %v4197_v0 = vld [vmem:[%s4782_s1 + $0x48] sm:$0xff]  ;;  %v4202_v1 = vld [vmem:[%s4782_s1 + $0x30] sm:$0xff]  ;;  %v66_v6 = vlaneseq  ;;  %v4146_v12 = vmov 0.0  }
  0x1d   :  { %3738 = vmatprep.subr.mxu1 %v4197_v0  ;;  %v4205_v2 = vld [vmem:[#allocation2] sm:$0xff]  ;;  %v4211_v3 = vld [vmem:[%s4782_s1 + $0x18] sm:$0xff]  ;;  %v4224_v5 = vld [vmem:[#allocation2 + $0x8] sm:$0xff]  ;;  %3759 = vmatprep.subr.mxu0 %v4146_v12  ;;  %s4147_s7 = smov 112   ;;  %s4148_s8 = smov 120   ;;  %vm4149_vm1 = vmmov 0  }
  0x1e   :  { %3739 = vmatpush3.msra.mxu1 %v4197_v0  ;;  %3746 = vmatprep.mubr.msk.f32.mxu1 %vm70_vm0, %v4205_v2  ;;  %v4220_v4 = vld [vmem:[%s4782_s1] sm:$0xff]  ;;  %v4230_v7 = vshrl.u32 %v66_v6, 7  ;;  %s4150_s9 = smov 104   ;;  %s4151_s10 = smov 96   ;;  %vm175_vm2 = vcmask 64512   ;;  %v4336_v30 = vld [vmem:[#allocation5 + $0x8] sm:$0xff] }
  0x1f   :  { %3740 = vmatprep.subr.mxu1 %v4202_v1  ;;  %v4233_v9 = vld [vmem:[#allocation5] sm:$0xff]  ;;  %3761 = vmatprep.mubr.msk.f32.mxu0 %vm4149_vm1, %v4146_v12  ;;  %v4338_v31 = vld [vmem:[#allocation5 + $0x10] sm:$0xff]  ;;  %v171_v32 = vrot.slane %v4336_v30, 5  ;;  %vm170_vm3 = vcmask 1042432   ;;  %s4152_s11 = smov 64   ;;  %s4153_s12 = smov 32  }
  0x20   :  { %3741 = vmatpush3.msra.mxu1 %v4202_v1  ;;  %v68_v8 = vsub.s32 0, %v4230_v7  ;;  %v172_v33 = vrot.slane %v4338_v31, 5  ;;  %s4154_s13 = smov 16   ;;  %s4155_s14 = smov 24   ;;  %vm1504_vm4 = vcmask 130048   ;;  %vm1507_vm5 = vcmask 195584  }
  0x21   :  { %3742 = vmatprep.subr.mxu1 %v4211_v3  ;;  %vm3424_vm6 = vcmask 523264  }
  0x22   :  { %3743 = vmatpush3.msra.mxu1 %v4211_v3  ;;  %v69_v11 = vrot.slane %v4233_v9, %v68_v8  ;;  %v173_v34 = vsel %vm170_vm3, %v171_v32, %v172_v33 }
  0x23   :  { %3744 = vmatprep.subr.mxu1 %v4220_v4 }
  0x24   :  { %3745 = vmatpush3.msra.mxu1 %v4220_v4 }
  0x25   :  { %3747 = vmatmul.mubr.msk.f32.vlgmr.msra.gmra.mxu1 %vm70_vm0, %v4224_v5  ;;  %3749 = vmatprep.subr.mxu1 %v4146_v12 }
  0x26   :  { %3751 = vmatprep.mubr.msk.f32.mxu1 %vm4149_vm1, %v4146_v12 }
  0xe5   :  { %v3748_v10 = vpop.f32.mrf.mxu1 }
  0xe6   :  { %v4250_v15 = vadd.f32 %v3748_v10, %v69_v11 }
  0xe7   :  { %v143_v13 = vpop.f32.mrf.mxu1 }
  0xe8   :  { %v4240_v14 = vadd.f32 %v143_v13, %v69_v11 }
  0xea   :  { %158 = vrot.lane.b32.xlu1 %v4240_v14, %s4147_s7  ;;  %154 = vrot.lane.b32.xlu0 %v4240_v14, %s4148_s8 }
  0xee   :  { %160 = vrot.lane.b32.xlu1 %v4250_v15, %s4147_s7  ;;  %156 = vrot.lane.b32.xlu0 %v4250_v15, %s4148_s8 }
  0xf2   :  { %164 = vrot.lane.b32.xlu1 %v4250_v15, %s4150_s9  ;;  %162 = vrot.lane.b32.xlu0 %v4240_v14, %s4150_s9 }
  0xf6   :  { %250 = vrot.lane.b32.xlu1 %v4250_v15, %s4151_s10  ;;  %166 = vrot.lane.b32.xlu0 %v4240_v14, %s4151_s10 }
 0x15c   :  { %v4264_v16 = vpop.permute.xlu1 %158  ;;  %v4266_v17 = vpop.permute.xlu0 %154 }
 0x15d   :  { %326 = vrot.lane.b32.xlu0 %v4266_v17, %s4151_s10 }
 0x160   :  { %v4270_v18 = vpop.permute.xlu1 %160  ;;  %v4272_v19 = vpop.permute.xlu0 %156 }
 0x161   :  { %478 = vrot.lane.b32.xlu0 %v4264_v16, %s4151_s10  ;;  %402 = vrot.lane.b32.xlu1 %v4272_v19, %s4151_s10 }
 0x164   :  { %v4278_v20 = vpop.permute.xlu0 %162  ;;  %v4284_v21 = vpop.permute.xlu1 %164 }
 0x165   :  { %554 = vrot.lane.b32.xlu1 %v4270_v18, %s4151_s10  ;;  %630 = vrot.lane.b32.xlu0 %v4278_v20, %s4151_s10 }
 0x168   :  { %v167_v22 = vpop.permute.xlu0 %166  ;;  %v251_v23 = vpop.permute.xlu1 %250 }
 0x169   :  { %706 = vrot.lane.b32.xlu1 %v4284_v21, %s4151_s10  ;;  %3750 = vmatpush3.xpose.msk.msra.mxu1 %vm175_vm2, %v167_v22 }
 0x16a   :  { %3754 = vmatprep.subr.mxu1 %v4146_v12 }
 0x16c   :  { %3752 = vmatmul.mubr.msk.f32.vlgmr.msra.gmra.mxu1 %vm175_vm2, %v4240_v14 }
 0x16d   :  { %3755 = vmatpush3.xpose.msk.msra.mxu1 %vm175_vm2, %v251_v23  ;;  %3756 = vmatprep.mubr.msk.f32.mxu1 %vm4149_vm1, %v4146_v12 }
 0x16e   :  { %3764 = vmatprep.subr.mxu1 %v4146_v12 }
 0x170   :  { %3757 = vmatmul.mubr.msk.f32.vlgmr.msra.gmra.mxu1 %vm175_vm2, %v4250_v15 }
 0x171   :  { %3766 = vmatprep.mubr.msk.f32.mxu1 %vm4149_vm1, %v4146_v12 }
 0x1cf   :  { %v327_v24 = vpop.permute.xlu0 %326 }
 0x1d0   :  { %3760 = vmatpush3.xpose.msk.msra.mxu0 %vm175_vm2, %v327_v24 }
 0x1d1   :  { %3769 = vmatprep.subr.mxu0 %v4146_v12 }
 0x1d3   :  { %v403_v25 = vpop.permute.xlu1 %402  ;;  %3762 = vmatmul.mubr.msk.f32.vlgmr.msra.gmra.mxu0 %vm175_vm2, %v4266_v17  ;;  %v479_v26 = vpop.permute.xlu0 %478 }
 0x1d4   :  { %3765 = vmatpush3.xpose.msk.msra.mxu1 %vm175_vm2, %v403_v25  ;;  %3770 = vmatpush3.xpose.msk.msra.mxu0 %vm175_vm2, %v479_v26 }
 0x1d5   :  { %3771 = vmatprep.mubr.msk.f32.mxu0 %vm4149_vm1, %v4146_v12  ;;  %3774 = vmatprep.subr.mxu1 %v4146_v12 }
 0x1d6   :  { %3779 = vmatprep.subr.mxu0 %v4146_v12 }
 0x1d7   :  { %v555_v27 = vpop.permute.xlu1 %554  ;;  %3767 = vmatmul.mubr.msk.f32.vlgmr.msra.gmra.mxu1 %vm175_vm2, %v4272_v19  ;;  %3772 = vmatmul.mubr.msk.f32.vlgmr.msra.gmra.mxu0 %vm175_vm2, %v4264_v16  ;;  %v631_v28 = vpop.permute.xlu0 %630 }
 0x1d8   :  { %3775 = vmatpush3.xpose.msk.msra.mxu1 %vm175_vm2, %v555_v27  ;;  %3780 = vmatpush3.xpose.msk.msra.mxu0 %vm175_vm2, %v631_v28 }
 0x1d9   :  { %3776 = vmatprep.mubr.msk.f32.mxu1 %vm4149_vm1, %v4146_v12  ;;  %3781 = vmatprep.mubr.msk.f32.mxu0 %vm4149_vm1, %v4146_v12 }
 0x1da   :  { %3784 = vmatprep.subr.mxu1 %v4146_v12  ;;  %3789 = vmatprep.subr.mxu0 %v4146_v12 }
 0x1db   :  { %v707_v29 = vpop.permute.xlu1 %706  ;;  %3777 = vmatmul.mubr.msk.f32.vlgmr.msra.gmra.mxu1 %vm175_vm2, %v4270_v18  ;;  %3782 = vmatmul.mubr.msk.f32.vlgmr.msra.gmra.mxu0 %vm175_vm2, %v4278_v20 }
 0x1dc   :  { %3785 = vmatpush3.xpose.msk.msra.mxu1 %vm175_vm2, %v707_v29  ;;  %3786 = vmatprep.mubr.msk.f32.mxu1 %vm4149_vm1, %v4146_v12 }
 0x1dd   :  { %3794 = vmatprep.subr.mxu1 %v4146_v12  ;;  %3791 = vmatprep.mubr.msk.f32.mxu0 %vm4149_vm1, %v4146_v12 }
 0x1df   :  { %3787 = vmatmul.mubr.msk.f32.vlgmr.msra.gmra.mxu1 %vm175_vm2, %v4284_v21 }
 0x1e0   :  { %3796 = vmatprep.mubr.msk.f32.mxu1 %vm4149_vm1, %v4146_v12 }
 0x22c   :  { %v246_v35 = vpop.f32.mrf.mxu1 }
 0x22d   :  { %v247_v36 = vadd.f32 %v246_v35, %v173_v34 }
 0x22e   :  { %v3753_v37 = vpop.f32.mrf.mxu1 }
 0x22f   :  { %v782_v38 = vsel %vm175_vm2, %v247_v36, -inf }
 0x230   :  { %783 = vmax.xlane.f32.xlu0 %v782_v38  ;;  %v322_v39 = vpop.f32.mrf.mxu1 }
 0x231   :  { %v323_v40 = vadd.f32 %v322_v39, %v173_v34 }
 0x232   :  { %v3758_v41 = vpop.f32.mrf.mxu1 }
 0x233   :  { %v785_v42 = vsel %vm175_vm2, %v323_v40, -inf }
 0x234   :  { %786 = vmax.xlane.f32.xlu1 %v785_v42 }
 0x293   :  { %v398_v43 = vpop.f32.mrf.mxu0 }
 0x294   :  { %v399_v44 = vadd.f32 %v398_v43, %v173_v34 }
 0x295   :  { %v3763_v45 = vpop.f32.mrf.mxu0 }
 0x296   :  { %v788_v46 = vsel %vm175_vm2, %v399_v44, -inf }
 0x297   :  { %v474_v47 = vpop.f32.mrf.mxu1  ;;  %789 = vmax.xlane.f32.xlu0 %v788_v46  ;;  %v550_v48 = vpop.f32.mrf.mxu0 }
 0x298   :  { %v475_v49 = vadd.f32 %v474_v47, %v173_v34  ;;  %v551_v50 = vadd.f32 %v550_v48, %v173_v34 }
 0x299   :  { %v3768_v51 = vpop.f32.mrf.mxu1  ;;  %v3773_v52 = vpop.f32.mrf.mxu0 }
 0x29a   :  { %v791_v53 = vsel %vm175_vm2, %v475_v49, -inf  ;;  %v794_v54 = vsel %vm175_vm2, %v551_v50, -inf }
 0x29b   :  { %v626_v55 = vpop.f32.mrf.mxu1  ;;  %792 = vmax.xlane.f32.xlu0 %v791_v53  ;;  %795 = vmax.xlane.f32.xlu1 %v794_v54  ;;  %v702_v56 = vpop.f32.mrf.mxu0 }
 0x29c   :  { %v627_v57 = vadd.f32 %v626_v55, %v173_v34  ;;  %v703_v58 = vadd.f32 %v702_v56, %v173_v34 }
 0x29d   :  { %v3778_v59 = vpop.f32.mrf.mxu1  ;;  %v3783_v60 = vpop.f32.mrf.mxu0 }
 0x29e   :  { %v797_v61 = vsel %vm175_vm2, %v627_v57, -inf  ;;  %v800_v62 = vsel %vm175_vm2, %v703_v58, -inf }
 0x29f   :  { %v778_v63 = vpop.f32.mrf.mxu1  ;;  %798 = vmax.xlane.f32.xlu0 %v797_v61  ;;  %801 = vmax.xlane.f32.xlu1 %v800_v62 }
 0x2a0   :  { %v779_v6 = vadd.f32 %v778_v63, %v173_v34 }
 0x2a1   :  { %v3788_v10 = vpop.f32.mrf.mxu1 }
 0x2a2   :  { %v803_v11 = vsel %vm175_vm2, %v779_v6, -inf }
 0x2a3   :  { %804 = vmax.xlane.f32.xlu0 %v803_v11 }
 0x2b0   :  { %870 = vrot.lane.b32.xlu1 %v4240_v14, %s4152_s11 }
 0x2b4   :  { %1022 = vrot.lane.b32.xlu1 %v4266_v17, %s4152_s11 }
 0x2b8   :  { %1098 = vrot.lane.b32.xlu1 %v4272_v19, %s4152_s11 }
 0x2b9   :  { %946 = vrot.lane.b32.xlu0 %v4250_v15, %s4152_s11  ;;  %v784_v23 = vpop.xlane.xlu0 %783 }
 0x2ba   :  { %v806_v24 = vsub.f32 %v247_v36, %v784_v23 }
 0x2bc   :  { %1250 = vrot.lane.b32.xlu1 %v4270_v18, %s4152_s11  ;;  %v814_v25 = vmul.f32 1.442695, %v806_v24 }
 0x2bd   :  { %1174 = vrot.lane.b32.xlu0 %v4264_v16, %s4152_s11  ;;  %v787_v13 = vpop.xlane.xlu1 %786 }
 0x2be   :  { %v807_v22 = vsub.f32 %v323_v40, %v787_v13 }
 0x2c0   :  { %v816_v14 = vmul.f32 1.442695, %v807_v22 }
 0x2c2   :  { %3998 = vpow2.f32 %v816_v14 }
 0x2c3   :  { %4000 = vpow2.f32 %v814_v25 }
 0x2cf   :  { %v4365_v17 = vpop.eup %3998 }
 0x2d0   :  { %v833_v19 = vsel %vm175_vm2, %v4365_v17, 0.0  ;;  %v4369_v15 = vpop.eup %4000 }
 0x2d1   :  { %v830_v18 = vsel %vm175_vm2, %v4369_v15, 0.0 }
 0x2dc   :  { %834 = vadd.xlane.f32.xlu0 %v833_v19 }
 0x2e0   :  { %831 = vadd.xlane.f32.xlu1 %v830_v18 }
 0x320   :  { %v790_v16 = vpop.xlane.xlu0 %789 }
 0x321   :  { %v808_v26 = vsub.f32 %v399_v44, %v790_v16 }
 0x323   :  { %v818_v27 = vmul.f32 1.442695, %v808_v26 }
 0x324   :  { %v796_v28 = vpop.xlane.xlu1 %795  ;;  %v793_v29 = vpop.xlane.xlu0 %792 }
 0x325   :  { %4002 = vpow2.f32 %v818_v27  ;;  %v810_v32 = vsub.f32 %v551_v50, %v796_v28  ;;  %v809_v34 = vsub.f32 %v475_v49, %v793_v29 }
 0x327   :  { %v822_v35 = vmul.f32 1.442695, %v810_v32  ;;  %v820_v36 = vmul.f32 1.442695, %v809_v34 }
 0x328   :  { %v802_v37 = vpop.xlane.xlu1 %801  ;;  %v799_v38 = vpop.xlane.xlu0 %798 }
 0x329   :  { %4004 = vpow2.f32 %v822_v35  ;;  %v812_v39 = vsub.f32 %v703_v58, %v802_v37  ;;  %v811_v40 = vsub.f32 %v627_v57, %v799_v38 }
 0x32a   :  { %4006 = vpow2.f32 %v820_v36 }
 0x32b   :  { %v826_v41 = vmul.f32 1.442695, %v812_v39  ;;  %v824_v42 = vmul.f32 1.442695, %v811_v40 }
 0x32c   :  { %v871_v43 = vpop.permute.xlu1 %870  ;;  %v805_v45 = vpop.xlane.xlu0 %804 }
 0x32d   :  { %4008 = vpow2.f32 %v826_v41  ;;  %v813_v44 = vsub.f32 %v779_v6, %v805_v45  ;;  %3790 = vmatpush3.msra.mxu0 %v871_v43 }
 0x32e   :  { %4010 = vpow2.f32 %v824_v42  ;;  %3799 = vmatprep.subr.mxu0 %v4146_v12 }
 0x32f   :  { %v828_v46 = vmul.f32 1.442695, %v813_v44 }
 0x330   :  { %v947_v47 = vpop.permute.xlu0 %946  ;;  %v1023_v60 = vpop.permute.xlu1 %1022 }
 0x331   :  { %4012 = vpow2.f32 %v828_v46  ;;  %3795 = vmatpush3.msra.mxu1 %v947_v47 }
 0x332   :  { %v4003_v48 = vpop.eup %4002  ;;  %3804 = vmatprep.subr.mxu1 %v4146_v12 }
 0x333   :  { %v836_v49 = vsel %vm175_vm2, %v4003_v48, 0.0 }
 0x334   :  { %837 = vadd.xlane.f32.xlu1 %v836_v49  ;;  %v1099_v61 = vpop.permute.xlu1 %1098  ;;  %v1175_v62 = vpop.permute.xlu0 %1174 }
 0x336   :  { %v4005_v50 = vpop.eup %4004 }
 0x337   :  { %v4007_v51 = vpop.eup %4006  ;;  %v842_v52 = vsel %vm175_vm2, %v4005_v50, 0.0 }
 0x338   :  { %843 = vadd.xlane.f32.xlu1 %v842_v52  ;;  %v839_v53 = vsel %vm175_vm2, %v4007_v51, 0.0  ;;  %v1251_v63 = vpop.permute.xlu1 %1250 }
 0x339   :  { %840 = vadd.xlane.f32.xlu0 %v839_v53 }
 0x33a   :  { %v4378_v54 = vpop.eup %4008 }
 0x33b   :  { %v4380_v55 = vpop.eup %4010  ;;  %v848_v56 = vsel %vm175_vm2, %v4378_v54, 0.0 }
 0x33c   :  { %849 = vadd.xlane.f32.xlu1 %v848_v56  ;;  %v845_v57 = vsel %vm175_vm2, %v4380_v55, 0.0 }
 0x33d   :  { %846 = vadd.xlane.f32.xlu0 %v845_v57 }
 0x33e   :  { %v4386_v58 = vpop.eup %4012 }
 0x33f   :  { %v851_v59 = vsel %vm175_vm2, %v4386_v58, 0.0 }
 0x341   :  { %852 = vadd.xlane.f32.xlu0 %v851_v59 }
 0x34d   :  { %1402 = vrot.lane.b32.xlu1 %v4284_v21, %s4152_s11 }
 0x351   :  { %1522 = vrot.lane.b32.xlu1 %v4202_v1, %s4153_s12 }
 0x355   :  { %1520 = vrot.lane.b32.xlu1 %v4211_v3, %s4153_s12 }
 0x357   :  { %1326 = vrot.lane.b32.xlu0 %v4278_v20, %s4152_s11 }
 0x35b   :  { %1524 = vrot.lane.b32.xlu0 %v4197_v0, %s4153_s12 }
 0x365   :  { %v835_v6 = vpop.xlane.xlu0 %834 }
 0x366   :  { %4014 = vrcp.f32 %v835_v6 }
 0x369   :  { %v832_v10 = vpop.xlane.xlu1 %831 }
 0x36a   :  { %4016 = vrcp.f32 %v832_v10 }
 0x373   :  { %v4015_v11 = vpop.eup %4014 }
 0x374   :  { %v863_v13 = vmul.f32 %v4015_v11, %v4365_v17 }
 0x376   :  { %3797 = vmatmul.mubr.msk.f32.vlgmr.msra.gmra.mxu1 %vm175_vm2, %v863_v13  ;;  %v1512_v13 = vsub.s32 1, %v4230_v7 }
 0x377   :  { %v4017_v22 = vpop.eup %4016  ;;  %3805 = vmatpush3.msra.mxu1 %v1099_v61  ;;  %3806 = vmatprep.mubr.msk.f32.mxu1 %vm4149_vm1, %v4146_v12 }
 0x378   :  { %v862_v20 = vmul.f32 %v4017_v22, %v4369_v15  ;;  %3814 = vmatprep.subr.mxu1 %v4146_v12  ;;  %v1513_v22 = vrot.slane %v4233_v9, %v1512_v13 }
 0x37a   :  { %3792 = vmatmul.mubr.msk.f32.vlgmr.msra.gmra.mxu0 %vm175_vm2, %v862_v20 }
 0x37b   :  { %3800 = vmatpush3.msra.mxu0 %v1023_v60  ;;  %3801 = vmatprep.mubr.msk.f32.mxu0 %vm4149_vm1, %v4146_v12 }
 0x37c   :  { %3809 = vmatprep.subr.mxu0 %v4146_v12 }
 0x3bd   :  { %v838_v21 = vpop.xlane.xlu1 %837 }
 0x3be   :  { %4018 = vrcp.f32 %v838_v21 }
 0x3c1   :  { %v844_v23 = vpop.xlane.xlu1 %843 }
 0x3c2   :  { %4020 = vrcp.f32 %v844_v23  ;;  %v841_v24 = vpop.xlane.xlu0 %840 }
 0x3c3   :  { %4022 = vrcp.f32 %v841_v24 }
 0x3c5   :  { %v850_v14 = vpop.xlane.xlu1 %849 }
 0x3c6   :  { %4024 = vrcp.f32 %v850_v14  ;;  %v847_v25 = vpop.xlane.xlu0 %846 }
 0x3c7   :  { %4026 = vrcp.f32 %v847_v25 }
 0x3c9   :  { %v1403_v32 = vpop.permute.xlu1 %1402 }
 0x3ca   :  { %v853_v17 = vpop.xlane.xlu0 %852 }
 0x3cb   :  { %v4019_v19 = vpop.eup %4018  ;;  %4028 = vrcp.f32 %v853_v17 }
 0x3cc   :  { %v864_v15 = vmul.f32 %v4019_v19, %v4003_v48 }
 0x3cd   :  { %v1523_v36 = vpop.permute.xlu1 %1522 }
 0x3ce   :  { %3802 = vmatmul.mubr.msk.f32.vlgmr.msra.gmra.mxu0 %vm175_vm2, %v864_v15  ;;  %v1327_v16 = vpop.permute.xlu0 %1326  ;;  %v4456_v15 = vld [vmem:[%s4782_s1 + $0x50] sm:$0xff] }
 0x3cf   :  { %v4021_v1 = vpop.eup %4020  ;;  %3810 = vmatpush3.msra.mxu0 %v1175_v62  ;;  %3811 = vmatprep.mubr.msk.f32.mxu0 %vm4149_vm1, %v4146_v12 }
 0x3d0   :  { %v4023_v0 = vpop.eup %4022  ;;  %3819 = vmatprep.subr.mxu0 %v4146_v12  ;;  %v866_v3 = vmul.f32 %v4021_v1, %v4005_v50  ;;  %v4481_v1 = vld [vmem:[%s4782_s1 + $0x8] sm:$0xff] }
 0x3d1   :  { %v865_v18 = vmul.f32 %v4023_v0, %v4007_v51  ;;  %v1521_v38 = vpop.permute.xlu1 %1520 }
 0x3d2   :  { %3812 = vmatmul.mubr.msk.f32.vlgmr.msra.gmra.mxu0 %vm175_vm2, %v866_v3  ;;  %v1525_v37 = vpop.permute.xlu0 %1524 }
 0x3d3   :  { %v4025_v26 = vpop.eup %4024  ;;  %3807 = vmatmul.mubr.msk.f32.vlgmr.msra.gmra.mxu1 %vm175_vm2, %v865_v18  ;;  %3820 = vmatpush3.msra.mxu0 %v1327_v16 }
 0x3d4   :  { %v4027_v27 = vpop.eup %4026  ;;  %3815 = vmatpush3.msra.mxu1 %v1251_v63  ;;  %3816 = vmatprep.mubr.msk.f32.mxu1 %vm4149_vm1, %v4146_v12  ;;  %v868_v28 = vmul.f32 %v4025_v26, %v4378_v54 }
 0x3d5   :  { %3821 = vmatprep.mubr.msk.f32.mxu0 %vm4149_vm1, %v4146_v12  ;;  %3824 = vmatprep.subr.mxu1 %v4146_v12  ;;  %v867_v29 = vmul.f32 %v4027_v27, %v4380_v55 }
 0x3d6   :  { %3822 = vmatmul.mubr.msk.f32.vlgmr.msra.gmra.mxu0 %vm175_vm2, %v868_v28  ;;  %3829 = vmatprep.subr.mxu0 %v1525_v37 }
 0x3d7   :  { %3817 = vmatmul.mubr.msk.f32.vlgmr.msra.gmra.mxu1 %vm175_vm2, %v867_v29  ;;  %3830 = vmatpush3.msra.mxu0 %v1525_v37 }
 0x3d8   :  { %v4029_v34 = vpop.eup %4028  ;;  %3825 = vmatpush3.msra.mxu1 %v1403_v32  ;;  %3826 = vmatprep.mubr.msk.f32.mxu1 %vm4149_vm1, %v4146_v12 }
 0x3d9   :  { %v869_v35 = vmul.f32 %v4029_v34, %v4386_v58  ;;  %3831 = vmatprep.subr.mxu0 %v1523_v36  ;;  %3840 = vmatprep.subr.mxu1 %v4456_v15 }
 0x3da   :  { %3832 = vmatpush3.msra.mxu0 %v1523_v36  ;;  %v48_v36 = vld [vmem:[#allocation2 + $0x10] sm:$0xff] }
 0x3db   :  { %3827 = vmatmul.mubr.msk.f32.vlgmr.msra.gmra.mxu1 %vm175_vm2, %v869_v35  ;;  %3833 = vmatprep.subr.mxu0 %v1521_v38 }
 0x3dc   :  { %3834 = vmatpush3.msra.mxu0 %v1521_v38  ;;  %3841 = vmatpush3.msra.mxu1 %v4456_v15 }
 0x436   :  { %v1018_v39 = vpop.f32.mrf.mxu1 }
 0x438   :  { %v3798_v40 = vpop.f32.mrf.mxu1 }
 0x43a   :  { %v942_v41 = vpop.f32.mrf.mxu0 }
 0x43c   :  { %v3793_v42 = vpop.f32.mrf.mxu0 }
 0x48e   :  { %v1094_v43 = vpop.f32.mrf.mxu0 }
 0x490   :  { %v3803_v45 = vpop.f32.mrf.mxu0 }
 0x492   :  { %v1246_v44 = vpop.f32.mrf.mxu0 }
 0x493   :  { %v1170_v46 = vpop.f32.mrf.mxu1  ;;  %1488 = vrot.lane.b32.xlu1 %v1246_v44, %s4154_s13 }
 0x494   :  { %1482 = vrot.lane.b32.xlu0 %v1170_v46, %s4144_s19  ;;  %v3813_v47 = vpop.f32.mrf.mxu0  ;;  %v49_v46 = vld [vmem:[#allocation2 + $0x18] sm:$0xff] }
 0x495   :  { %v3808_v48 = vpop.f32.mrf.mxu1  ;;  %v1642_v47 = vsub.s32 7, %v4230_v7 }
 0x496   :  { %v1398_v49 = vpop.f32.mrf.mxu0 }
 0x497   :  { %v1322_v50 = vpop.f32.mrf.mxu1  ;;  %1496 = vrot.lane.b32.xlu1 %v1398_v49, %s4155_s14 }
 0x498   :  { %1480 = vrot.lane.b32.xlu0 %v1094_v43, %s4144_s19  ;;  %v3823_v51 = vpop.f32.mrf.mxu0 }
 0x499   :  { %v3818_v52 = vpop.f32.mrf.mxu1  ;;  %v1648_v51 = vsub.s32 2, %v4230_v7 }
 0x49b   :  { %v1474_v53 = vpop.f32.mrf.mxu1 }
 0x49c   :  { %1490 = vrot.lane.b32.xlu0 %v1322_v50, %s4154_s13  ;;  %1498 = vrot.lane.b32.xlu1 %v1474_v53, %s4155_s14  ;;  %v1643_v50 = vrot.slane %v4233_v9, %v1642_v47 }
 0x49d   :  { %v3828_v54 = vpop.f32.mrf.mxu1 }
 0x4a0   :  { %1518 = vrot.lane.b32.xlu0 %v4220_v4, %s4153_s12 }
 0x505   :  { %v1489_v55 = vpop.permute.xlu1 %1488 }
 0x506   :  { %v1483_v56 = vpop.permute.xlu0 %1482 }
 0x507   :  { %v1503_v63 = vsel %vm175_vm2, %v1018_v39, %v1483_v56 }
 0x509   :  { %v1497_v58 = vpop.permute.xlu1 %1496 }
 0x50a   :  { %v1481_v57 = vpop.permute.xlu0 %1480 }
 0x50b   :  { %v1502_v59 = vsel %vm175_vm2, %v942_v41, %v1481_v57 }
 0x50c   :  { %v1505_v60 = vsel %vm1504_vm4, %v1502_v59, %v1489_v55  ;;  %v1649_v55 = vrot.slane %v4336_v30, %v1648_v51  ;;  %v1739_v59 = vsub.s32 3, %v4230_v7 }
 0x50d   :  { %v1508_v61 = vsel %vm1507_vm5, %v1505_v60, %v1497_v58 }
 0x50e   :  { %3837 = vmatprep.mubr.msk.f32.mxu0 %vm70_vm0, %v1508_v61  ;;  %v1491_v62 = vpop.permute.xlu0 %1490  ;;  %v1499_v6 = vpop.permute.xlu1 %1498  ;;  %v1740_v30 = vrot.slane %v4233_v9, %v1739_v59 }
 0x50f   :  { %v1506_v4 = vsel %vm1504_vm4, %v1503_v63, %v1491_v62 }
 0x510   :  { %v1509_v11 = vsel %vm1507_vm5, %v1506_v4, %v1499_v6  ;;  %v1655_v6 = vrot.slane %v4233_v9, %v1648_v51 }
 0x512   :  { %v1519_v10 = vpop.permute.xlu0 %1518 }
 0x513   :  { %3835 = vmatprep.subr.mxu0 %v1519_v10 }
 0x514   :  { %3836 = vmatpush3.msra.mxu0 %v1519_v10 }
 0x515   :  { %3838 = vmatmul.mubr.msk.f32.vlgmr.msra.gmra.mxu0 %vm70_vm0, %v1509_v11 }
 0x516   :  { %3859 = vmatprep.mubr.msk.f32.mxu0 %vm70_vm0, %v48_v36 }
 0x5d5   :  { %v3839_v20 = vpop.f32.mrf.mxu0 }
 0x5d6   :  { %v1608_v21 = vadd.f32 %v3839_v20, %v1513_v22 }
 0x5d7   :  { %v1602_v23 = vpop.f32.mrf.mxu0 }
 0x5d8   :  { %v1603_v24 = vadd.f32 %v1602_v23, %v1513_v22  ;;  %v1612_v14 = vadd.f32 %v1608_v21, %v4224_v5  ;;  %v4464_v5 = vld [vmem:[%s4782_s1 + $0x20] sm:$0xff] }
 0x5da   :  { %v1616_v25 = vsel %vm70_vm0, %v1612_v14, 0.0  ;;  %v1611_v17 = vadd.f32 %v1603_v24, %v4205_v2  ;;  %v4469_v2 = vld [vmem:[%s4782_s1 + $0x38] sm:$0xff] }
 0x5db   :  { %1617 = vadd.xlane.f32.xlu1 %v1616_v25  ;;  %3842 = vmatprep.subr.mxu1 %v4469_v2 }
 0x5dc   :  { %v1613_v19 = vsel %vm70_vm0, %v1611_v17, 0.0  ;;  %3843 = vmatpush3.msra.mxu1 %v4469_v2 }
 0x5dd   :  { %1614 = vadd.xlane.f32.xlu0 %v1613_v19  ;;  %3844 = vmatprep.subr.mxu1 %v4464_v5 }
 0x5de   :  { %3845 = vmatpush3.msra.mxu1 %v4464_v5 }
 0x5df   :  { %3846 = vmatprep.subr.mxu1 %v4481_v1 }
 0x5e0   :  { %3847 = vmatpush3.msra.mxu1 %v4481_v1 }
 0x5e1   :  { %3862 = vmatprep.subr.mxu1 %v4146_v12 }
 0x5ec   :  { %1751 = vrot.lane.b32.xlu1 %v4456_v15, %s4151_s10 }
 0x5f0   :  { %1747 = vrot.lane.b32.xlu1 %v4464_v5, %s4151_s10 }
 0x5f4   :  { %1745 = vrot.lane.b32.xlu1 %v4481_v1, %s4151_s10 }
 0x664   :  { %v1618_v0 = vpop.xlane.xlu1 %1617 }
 0x665   :  { %v1621_v3 = vmul.f32 0.03125, %v1618_v0 }
 0x666   :  { %v1615_v18 = vpop.xlane.xlu0 %1614 }
 0x667   :  { %v1623_v16 = vsub.f32 %v1612_v14, %v1621_v3  ;;  %v1620_v26 = vmul.f32 0.03125, %v1615_v18 }
 0x668   :  { %v1752_v35 = vpop.permute.xlu1 %1751 }
 0x669   :  { %v1622_v27 = vsub.f32 %v1611_v17, %v1620_v26  ;;  %v1625_v28 = vmul.f32 %v1623_v16, %v1623_v16  ;;  %3851 = vmatprep.subr.mxu0 %v1752_v35 }
 0x66a   :  { %3852 = vmatpush3.msra.mxu0 %v1752_v35 }
 0x66b   :  { %v1629_v29 = vsel %vm70_vm0, %v1625_v28, 0.0  ;;  %v1624_v32 = vmul.f32 %v1622_v27, %v1622_v27 }
 0x66c   :  { %1630 = vadd.xlane.f32.xlu0 %v1629_v29  ;;  %v1748_v41 = vpop.permute.xlu1 %1747 }
 0x66d   :  { %v1626_v34 = vsel %vm70_vm0, %v1624_v32, 0.0 }
 0x670   :  { %1627 = vadd.xlane.f32.xlu0 %v1626_v34  ;;  %v1746_v44 = vpop.permute.xlu1 %1745 }
 0x686   :  { %1749 = vrot.lane.b32.xlu0 %v4469_v2, %s4151_s10 }
 0x6f5   :  { %v1631_v37 = vpop.xlane.xlu0 %1630 }
 0x6f6   :  { %v1633_v38 = vmul.f32 0.03125, %v1631_v37 }
 0x6f8   :  { %v1635_v39 = vadd.f32 1e-05, %v1633_v38 }
 0x6f9   :  { %v1628_v40 = vpop.xlane.xlu0 %1627 }
 0x6fa   :  { %4030 = vrsqrt.f32 %v1635_v39  ;;  %v1632_v42 = vmul.f32 0.03125, %v1628_v40 }
 0x6fc   :  { %v1634_v43 = vadd.f32 1e-05, %v1632_v42 }
 0x6fd   :  { %v1750_v45 = vpop.permute.xlu0 %1749 }
 0x6fe   :  { %4032 = vrsqrt.f32 %v1634_v43  ;;  %3853 = vmatprep.subr.mxu0 %v1750_v45 }
 0x6ff   :  { %3854 = vmatpush3.msra.mxu0 %v1750_v45 }
 0x700   :  { %3855 = vmatprep.subr.mxu0 %v1748_v41 }
 0x701   :  { %3856 = vmatpush3.msra.mxu0 %v1748_v41 }
 0x702   :  { %3857 = vmatprep.subr.mxu0 %v1746_v44 }
 0x703   :  { %3858 = vmatpush3.msra.mxu0 %v1746_v44 }
 0x704   :  { %3860 = vmatmul.mubr.msk.f32.vlgmr.msra.gmra.mxu0 %vm70_vm0, %v49_v46  ;;  %3872 = vmatprep.subr.mxu0 %v4146_v12 }
 0x705   :  { %3874 = vmatprep.mubr.msk.f32.mxu0 %vm4149_vm1, %v4146_v12 }
 0x707   :  { %v4031_v48 = vpop.eup %4030 }
 0x708   :  { %v1639_v49 = vmul.f32 %v4031_v48, %v1623_v16  ;;  %v65_v16 = vld [vmem:[#allocation5 + $0x18] sm:$0xff] }
 0x709   :  { %v1867_v26 = vrot.slane %v65_v16, 5 }
 0x70a   :  { %v1645_v54 = vmul.f32 %v1643_v50, %v1639_v49 }
 0x70b   :  { %v4033_v52 = vpop.eup %4032 }
 0x70c   :  { %v1638_v53 = vmul.f32 %v4033_v52, %v1622_v27  ;;  %v4503_v58 = vadd.f32 %v1649_v55, %v1645_v54  ;;  %v1868_v27 = vsel %vm170_vm3, %v172_v33, %v1867_v26 }
 0x70e   :  { %v1644_v56 = vmul.f32 %v1643_v50, %v1638_v53 }
 0x710   :  { %v4501_v57 = vadd.f32 %v1649_v55, %v1644_v56 }
 0x712   :  { %3848 = vmatprep.mubr.msk.f32.mxu1 %vm70_vm0, %v4501_v57 }
 0x713   :  { %3849 = vmatmul.mubr.msk.f32.vlgmr.msra.gmra.mxu1 %vm70_vm0, %v4503_v58 }
 0x714   :  { %3864 = vmatprep.mubr.msk.f32.mxu1 %vm4149_vm1, %v4146_v12 }
 0x7c4   :  { %v3861_v60 = vpop.f32.mrf.mxu0 }
 0x7c5   :  { %v4515_v61 = vadd.f32 %v3861_v60, %v1740_v30 }
 0x7c6   :  { %v1829_v62 = vpop.f32.mrf.mxu0 }
 0x7c7   :  { %v4517_v63 = vadd.f32 %v1829_v62, %v1740_v30  ;;  %1856 = vrot.lane.b32.xlu1 %v4515_v61, %s4148_s8 }
 0x7c9   :  { %1854 = vrot.lane.b32.xlu0 %v4517_v63, %s4148_s8  ;;  %3863 = vmatpush3.xpose.msk.msra.mxu1 %vm175_vm2, %v4517_v63 }
 0x7ca   :  { %3867 = vmatprep.subr.mxu1 %v4146_v12 }
 0x7cb   :  { %1860 = vrot.lane.b32.xlu1 %v4515_v61, %s4147_s7 }
 0x7cd   :  { %1858 = vrot.lane.b32.xlu0 %v4517_v63, %s4147_s7 }
 0x7cf   :  { %1864 = vrot.lane.b32.xlu1 %v4515_v61, %s4150_s9 }
 0x7d1   :  { %1862 = vrot.lane.b32.xlu0 %v4517_v63, %s4150_s9 }
 0x7d3   :  { %v3850_v4 = vpop.f32.mrf.mxu1 }
 0x7d4   :  { %v1734_v10 = vadd.f32 %v3850_v4, %v1655_v6 }
 0x7d5   :  { %v1728_v11 = vpop.f32.mrf.mxu1 }
 0x7d6   :  { %v1729_v22 = vadd.f32 %v1728_v11, %v1655_v6  ;;  %1842 = vrot.lane.b32.xlu1 %v1734_v10, %s4148_s8 }
 0x7d8   :  { %1840 = vrot.lane.b32.xlu0 %v1729_v22, %s4148_s8  ;;  %3865 = vmatmul.mubr.msk.f32.vlgmr.msra.gmra.mxu1 %vm175_vm2, %v1729_v22 }
 0x7d9   :  { %3868 = vmatpush3.xpose.msk.msra.mxu1 %vm175_vm2, %v4515_v61  ;;  %3869 = vmatprep.mubr.msk.f32.mxu1 %vm4149_vm1, %v4146_v12 }
 0x7da   :  { %1846 = vrot.lane.b32.xlu1 %v1734_v10, %s4147_s7  ;;  %3877 = vmatprep.subr.mxu1 %v4146_v12 }
 0x7dc   :  { %1844 = vrot.lane.b32.xlu0 %v1729_v22, %s4147_s7  ;;  %3870 = vmatmul.mubr.msk.f32.vlgmr.msra.gmra.mxu1 %vm175_vm2, %v1734_v10 }
 0x7dd   :  { %3879 = vmatprep.mubr.msk.f32.mxu1 %vm4149_vm1, %v4146_v12 }
 0x7de   :  { %1850 = vrot.lane.b32.xlu1 %v1734_v10, %s4150_s9 }
 0x7e0   :  { %1848 = vrot.lane.b32.xlu0 %v1729_v22, %s4150_s9 }
 0x839   :  { %v4550_v9 = vpop.permute.xlu1 %1856 }
 0x83a   :  { %3878 = vmatpush3.xpose.msk.msra.mxu1 %vm175_vm2, %v4550_v9 }
 0x83b   :  { %v4554_v20 = vpop.permute.xlu0 %1854  ;;  %3887 = vmatprep.subr.mxu1 %v4146_v12 }
 0x83c   :  { %3873 = vmatpush3.xpose.msk.msra.mxu0 %vm175_vm2, %v4554_v20 }
 0x83d   :  { %3882 = vmatprep.subr.mxu0 %v4146_v12  ;;  %v4560_v21 = vpop.permute.xlu1 %1860 }
 0x83f   :  { %v4562_v23 = vpop.permute.xlu0 %1858 }
 0x841   :  { %v4564_v24 = vpop.permute.xlu1 %1864 }
 0x843   :  { %v4566_v14 = vpop.permute.xlu0 %1862 }
 0x848   :  { %v1843_v25 = vpop.permute.xlu1 %1842 }
 0x849   :  { %3880 = vmatmul.mubr.msk.f32.vlgmr.msra.gmra.mxu1 %vm175_vm2, %v1843_v25 }
 0x84a   :  { %3888 = vmatpush3.xpose.msk.msra.mxu1 %vm175_vm2, %v4560_v21  ;;  %v1841_v17 = vpop.permute.xlu0 %1840  ;;  %3889 = vmatprep.mubr.msk.f32.mxu1 %vm4149_vm1, %v4146_v12 }
 0x84b   :  { %3875 = vmatmul.mubr.msk.f32.vlgmr.msra.gmra.mxu0 %vm175_vm2, %v1841_v17  ;;  %3897 = vmatprep.subr.mxu1 %v4146_v12 }
 0x84c   :  { %3883 = vmatpush3.xpose.msk.msra.mxu0 %vm175_vm2, %v4562_v23  ;;  %v1847_v19 = vpop.permute.xlu1 %1846  ;;  %3884 = vmatprep.mubr.msk.f32.mxu0 %vm4149_vm1, %v4146_v12 }
 0x84d   :  { %3890 = vmatmul.mubr.msk.f32.vlgmr.msra.gmra.mxu1 %vm175_vm2, %v1847_v19  ;;  %3892 = vmatprep.subr.mxu0 %v4146_v12 }
 0x84e   :  { %3898 = vmatpush3.xpose.msk.msra.mxu1 %vm175_vm2, %v4564_v24  ;;  %v1845_v0 = vpop.permute.xlu0 %1844  ;;  %3899 = vmatprep.mubr.msk.f32.mxu1 %vm4149_vm1, %v4146_v12 }
 0x84f   :  { %3885 = vmatmul.mubr.msk.f32.vlgmr.msra.gmra.mxu0 %vm175_vm2, %v1845_v0  ;;  %3907 = vmatprep.subr.mxu1 %v4146_v12 }
 0x850   :  { %3893 = vmatpush3.xpose.msk.msra.mxu0 %vm175_vm2, %v4566_v14  ;;  %v1851_v3 = vpop.permute.xlu1 %1850  ;;  %3894 = vmatprep.mubr.msk.f32.mxu0 %vm4149_vm1, %v4146_v12 }
 0x851   :  { %3900 = vmatmul.mubr.msk.f32.vlgmr.msra.gmra.mxu1 %vm175_vm2, %v1851_v3  ;;  %3902 = vmatprep.subr.mxu0 %v4146_v12 }
 0x852   :  { %v1849_v18 = vpop.permute.xlu0 %1848  ;;  %3909 = vmatprep.mubr.msk.f32.mxu1 %vm4149_vm1, %v4146_v12 }
 0x853   :  { %3895 = vmatmul.mubr.msk.f32.vlgmr.msra.gmra.mxu0 %vm175_vm2, %v1849_v18 }
 0x854   :  { %3904 = vmatprep.mubr.msk.f32.mxu0 %vm4149_vm1, %v4146_v12 }
 0x898   :  { %v1940_v28 = vpop.f32.mrf.mxu1 }
 0x899   :  { %v1941_v29 = vadd.f32 %v1940_v28, %v1868_v27 }
 0x89a   :  { %v3866_v32 = vpop.f32.mrf.mxu1 }
 0x89b   :  { %v2462_v34 = vsel %vm175_vm2, %v1941_v29, -inf }
 0x89c   :  { %2463 = vmax.xlane.f32.xlu0 %v2462_v34  ;;  %v2014_v35 = vpop.f32.mrf.mxu1 }
 0x89d   :  { %v2015_v36 = vadd.f32 %v2014_v35, %v1868_v27 }
 0x89e   :  { %v3871_v37 = vpop.f32.mrf.mxu1 }
 0x89f   :  { %v2465_v38 = vsel %vm175_vm2, %v2015_v36, -inf }
 0x8a0   :  { %2466 = vmax.xlane.f32.xlu1 %v2465_v38 }
 0x909   :  { %v2162_v39 = vpop.f32.mrf.mxu1 }
 0x90a   :  { %v2163_v45 = vadd.f32 %v2162_v39, %v1868_v27 }
 0x90b   :  { %v2088_v40 = vpop.f32.mrf.mxu0  ;;  %v3881_v41 = vpop.f32.mrf.mxu1 }
 0x90c   :  { %v2089_v42 = vadd.f32 %v2088_v40, %v1868_v27  ;;  %v2471_v52 = vsel %vm175_vm2, %v2163_v45, -inf }
 0x90d   :  { %v3876_v43 = vpop.f32.mrf.mxu0  ;;  %v2310_v31 = vpop.f32.mrf.mxu1 }
 0x90e   :  { %v2468_v33 = vsel %vm175_vm2, %v2089_v42, -inf  ;;  %v2311_v50 = vadd.f32 %v2310_v31, %v1868_v27 }
 0x90f   :  { %v2236_v44 = vpop.f32.mrf.mxu0  ;;  %2469 = vmax.xlane.f32.xlu0 %v2468_v33  ;;  %v3891_v46 = vpop.f32.mrf.mxu1 }
 0x910   :  { %v2237_v47 = vadd.f32 %v2236_v44, %v1868_v27  ;;  %v2477_v62 = vsel %vm175_vm2, %v2311_v50, -inf }
 0x911   :  { %v3886_v48 = vpop.f32.mrf.mxu0  ;;  %v2458_v49 = vpop.f32.mrf.mxu1 }
 0x912   :  { %v2474_v51 = vsel %vm175_vm2, %v2237_v47, -inf  ;;  %v2459_v30 = vadd.f32 %v2458_v49, %v1868_v27 }
 0x913   :  { %v2384_v53 = vpop.f32.mrf.mxu0  ;;  %2475 = vmax.xlane.f32.xlu1 %v2474_v51  ;;  %2472 = vmax.xlane.f32.xlu0 %v2471_v52  ;;  %v3901_v54 = vpop.f32.mrf.mxu1 }
 0x914   :  { %v2385_v55 = vadd.f32 %v2384_v53, %v1868_v27  ;;  %v2483_v6 = vsel %vm175_vm2, %v2459_v30, -inf }
 0x915   :  { %v3896_v56 = vpop.f32.mrf.mxu0 }
 0x916   :  { %v2480_v60 = vsel %vm175_vm2, %v2385_v55, -inf }
 0x917   :  { %2481 = vmax.xlane.f32.xlu1 %v2480_v60  ;;  %2478 = vmax.xlane.f32.xlu0 %v2477_v62 }
 0x91b   :  { %2484 = vmax.xlane.f32.xlu0 %v2483_v6 }
 0x925   :  { %v2464_v11 = vpop.xlane.xlu0 %2463 }
 0x926   :  { %v2486_v22 = vsub.f32 %v1941_v29, %v2464_v11 }
 0x928   :  { %2550 = vrot.lane.b32.xlu1 %v4517_v63, %s4151_s10  ;;  %v2494_v25 = vmul.f32 1.442695, %v2486_v22 }
 0x929   :  { %v2467_v4 = vpop.xlane.xlu1 %2466 }
 0x92a   :  { %v2487_v10 = vsub.f32 %v2015_v36, %v2467_v4 }
 0x92c   :  { %2702 = vrot.lane.b32.xlu1 %v4554_v20, %s4151_s10  ;;  %v2496_v63 = vmul.f32 1.442695, %v2487_v10 }
 0x92e   :  { %4034 = vpow2.f32 %v2496_v63 }
 0x92f   :  { %4036 = vpow2.f32 %v2494_v25 }
 0x930   :  { %2778 = vrot.lane.b32.xlu1 %v4550_v9, %s4151_s10 }
 0x931   :  { %2626 = vrot.lane.b32.xlu0 %v4515_v61, %s4151_s10 }
 0x934   :  { %2930 = vrot.lane.b32.xlu1 %v4560_v21, %s4151_s10 }
 0x935   :  { %2854 = vrot.lane.b32.xlu0 %v4562_v23, %s4151_s10 }
 0x93b   :  { %v4621_v20 = vpop.eup %4034 }
 0x93c   :  { %v2513_v9 = vsel %vm175_vm2, %v4621_v20, 0.0  ;;  %v4625_v61 = vpop.eup %4036 }
 0x93d   :  { %v2510_v21 = vsel %vm175_vm2, %v4625_v61, 0.0 }
 0x954   :  { %2514 = vadd.xlane.f32.xlu0 %v2513_v9 }
 0x958   :  { %2511 = vadd.xlane.f32.xlu1 %v2510_v21 }
 0x998   :  { %v2470_v23 = vpop.xlane.xlu0 %2469 }
 0x999   :  { %v2488_v17 = vsub.f32 %v2089_v42, %v2470_v23 }
 0x99b   :  { %v2498_v19 = vmul.f32 1.442695, %v2488_v17 }
 0x99c   :  { %v2476_v0 = vpop.xlane.xlu1 %2475  ;;  %v2473_v3 = vpop.xlane.xlu0 %2472 }
 0x99d   :  { %4038 = vpow2.f32 %v2498_v19  ;;  %v2490_v18 = vsub.f32 %v2237_v47, %v2476_v0  ;;  %v2489_v16 = vsub.f32 %v2163_v45, %v2473_v3 }
 0x99f   :  { %v2502_v26 = vmul.f32 1.442695, %v2490_v18  ;;  %v2500_v27 = vmul.f32 1.442695, %v2489_v16 }
 0x9a0   :  { %v2482_v28 = vpop.xlane.xlu1 %2481  ;;  %v2479_v29 = vpop.xlane.xlu0 %2478 }
 0x9a1   :  { %4040 = vpow2.f32 %v2502_v26  ;;  %v2492_v32 = vsub.f32 %v2385_v55, %v2482_v28  ;;  %v2491_v34 = vsub.f32 %v2311_v50, %v2479_v29 }
 0x9a2   :  { %4042 = vpow2.f32 %v2500_v27 }
 0x9a3   :  { %v2506_v35 = vmul.f32 1.442695, %v2492_v32  ;;  %v2504_v36 = vmul.f32 1.442695, %v2491_v34 }
 0x9a4   :  { %v2551_v37 = vpop.permute.xlu1 %2550  ;;  %v2485_v38 = vpop.xlane.xlu0 %2484 }
 0x9a5   :  { %4044 = vpow2.f32 %v2506_v35  ;;  %v2493_v39 = vsub.f32 %v2459_v30, %v2485_v38  ;;  %3903 = vmatpush3.msra.mxu0 %v2551_v37 }
 0x9a6   :  { %4046 = vpow2.f32 %v2504_v36  ;;  %3912 = vmatprep.subr.mxu0 %v4146_v12 }
 0x9a7   :  { %v2508_v40 = vmul.f32 1.442695, %v2493_v39 }
 0x9a8   :  { %v2627_v41 = vpop.permute.xlu0 %2626  ;;  %v2703_v52 = vpop.permute.xlu1 %2702 }
 0x9a9   :  { %4048 = vpow2.f32 %v2508_v40  ;;  %3908 = vmatpush3.msra.mxu1 %v2627_v41 }
 0x9aa   :  { %v4039_v42 = vpop.eup %4038  ;;  %3917 = vmatprep.subr.mxu1 %v4146_v12 }
 0x9ab   :  { %v2516_v43 = vsel %vm175_vm2, %v4039_v42, 0.0 }
 0x9ac   :  { %2517 = vadd.xlane.f32.xlu1 %v2516_v43  ;;  %v2779_v53 = vpop.permute.xlu1 %2778  ;;  %v2855_v54 = vpop.permute.xlu0 %2854 }
 0x9ae   :  { %v4041_v31 = vpop.eup %4040 }
 0x9af   :  { %v4043_v45 = vpop.eup %4042  ;;  %v2522_v33 = vsel %vm175_vm2, %v4041_v31, 0.0 }
 0x9b0   :  { %2523 = vadd.xlane.f32.xlu1 %v2522_v33  ;;  %v2519_v44 = vsel %vm175_vm2, %v4043_v45, 0.0  ;;  %v2931_v55 = vpop.permute.xlu1 %2930 }
 0x9b1   :  { %2520 = vadd.xlane.f32.xlu0 %v2519_v44 }
 0x9b2   :  { %v4634_v46 = vpop.eup %4044 }
 0x9b3   :  { %v4636_v47 = vpop.eup %4046  ;;  %v2528_v48 = vsel %vm175_vm2, %v4634_v46, 0.0 }
 0x9b4   :  { %2529 = vadd.xlane.f32.xlu1 %v2528_v48  ;;  %v2525_v49 = vsel %vm175_vm2, %v4636_v47, 0.0 }
 0x9b5   :  { %2526 = vadd.xlane.f32.xlu0 %v2525_v49 }
 0x9b6   :  { %v4642_v50 = vpop.eup %4048 }
 0x9b7   :  { %v2531_v51 = vsel %vm175_vm2, %v4642_v50, 0.0 }
 0x9b9   :  { %2532 = vadd.xlane.f32.xlu0 %v2531_v51 }
 0x9c5   :  { %3082 = vrot.lane.b32.xlu1 %v4564_v24, %s4151_s10 }
 0x9c9   :  { %3196 = vrot.lane.b32.xlu1 %v4469_v2, %s4153_s12 }
 0x9cd   :  { %3194 = vrot.lane.b32.xlu1 %v4464_v5, %s4153_s12 }
 0x9cf   :  { %3006 = vrot.lane.b32.xlu0 %v4566_v14, %s4151_s10 }
 0x9d3   :  { %3198 = vrot.lane.b32.xlu0 %v4456_v15, %s4153_s12 }
 0x9dd   :  { %v2515_v56 = vpop.xlane.xlu0 %2514 }
 0x9de   :  { %4050 = vrcp.f32 %v2515_v56  ;;  %v3190_v56 = vsub.s32 4, %v4230_v7 }
 0x9e1   :  { %v2512_v30 = vpop.xlane.xlu1 %2511 }
 0x9e2   :  { %4052 = vrcp.f32 %v2512_v30  ;;  %v4702_v30 = vld [vmem:[#allocation5] sm:$0xff] }
 0x9eb   :  { %v4051_v24 = vpop.eup %4050 }
 0x9ec   :  { %v2543_v2 = vmul.f32 %v4051_v24, %v4621_v20  ;;  %v3191_v24 = vrot.slane %v4702_v30, %v3190_v56 }
 0x9ee   :  { %3910 = vmatmul.mubr.msk.f32.vlgmr.msra.gmra.mxu1 %vm175_vm2, %v2543_v2 }
 0x9ef   :  { %v4053_v5 = vpop.eup %4052  ;;  %3918 = vmatpush3.msra.mxu1 %v2779_v53  ;;  %3919 = vmatprep.mubr.msk.f32.mxu1 %vm4149_vm1, %v4146_v12 }
 0x9f0   :  { %v2542_v14 = vmul.f32 %v4053_v5, %v4625_v61  ;;  %3927 = vmatprep.subr.mxu1 %v4146_v12 }
 0x9f2   :  { %3905 = vmatmul.mubr.msk.f32.vlgmr.msra.gmra.mxu0 %vm175_vm2, %v2542_v14 }
 0x9f3   :  { %3913 = vmatpush3.msra.mxu0 %v2703_v52  ;;  %3914 = vmatprep.mubr.msk.f32.mxu0 %vm4149_vm1, %v4146_v12 }
 0x9f4   :  { %3922 = vmatprep.subr.mxu0 %v4146_v12 }
 0xa35   :  { %v2518_v15 = vpop.xlane.xlu1 %2517 }
 0xa36   :  { %4054 = vrcp.f32 %v2518_v15 }
 0xa39   :  { %v2524_v60 = vpop.xlane.xlu1 %2523 }
 0xa3a   :  { %4056 = vrcp.f32 %v2524_v60  ;;  %v2521_v62 = vpop.xlane.xlu0 %2520 }
 0xa3b   :  { %4058 = vrcp.f32 %v2521_v62 }
 0xa3d   :  { %v2530_v6 = vpop.xlane.xlu1 %2529 }
 0xa3e   :  { %4060 = vrcp.f32 %v2530_v6  ;;  %v2527_v4 = vpop.xlane.xlu0 %2526 }
 0xa3f   :  { %4062 = vrcp.f32 %v2527_v4 }
 0xa41   :  { %v3083_v0 = vpop.permute.xlu1 %3082 }
 0xa42   :  { %v2533_v10 = vpop.xlane.xlu0 %2532 }
 0xa43   :  { %v4055_v11 = vpop.eup %4054  ;;  %4064 = vrcp.f32 %v2533_v10 }
 0xa44   :  { %v2544_v22 = vmul.f32 %v4055_v11, %v4039_v42 }
 0xa45   :  { %v3197_v16 = vpop.permute.xlu1 %3196 }
 0xa46   :  { %3915 = vmatmul.mubr.msk.f32.vlgmr.msra.gmra.mxu0 %vm175_vm2, %v2544_v22  ;;  %v3007_v61 = vpop.permute.xlu0 %3006 }
 0xa47   :  { %v4057_v63 = vpop.eup %4056  ;;  %3923 = vmatpush3.msra.mxu0 %v2855_v54  ;;  %3924 = vmatprep.mubr.msk.f32.mxu0 %vm4149_vm1, %v4146_v12 }
 0xa48   :  { %v4059_v25 = vpop.eup %4058  ;;  %3932 = vmatprep.subr.mxu0 %v4146_v12  ;;  %v2546_v20 = vmul.f32 %v4057_v63, %v4041_v31 }
 0xa49   :  { %v2545_v9 = vmul.f32 %v4059_v25, %v4043_v45  ;;  %v3195_v27 = vpop.permute.xlu1 %3194 }
 0xa4a   :  { %3925 = vmatmul.mubr.msk.f32.vlgmr.msra.gmra.mxu0 %vm175_vm2, %v2546_v20  ;;  %v3199_v26 = vpop.permute.xlu0 %3198 }
 0xa4b   :  { %v4061_v21 = vpop.eup %4060  ;;  %3920 = vmatmul.mubr.msk.f32.vlgmr.msra.gmra.mxu1 %vm175_vm2, %v2545_v9  ;;  %3933 = vmatpush3.msra.mxu0 %v3007_v61 }
 0xa4c   :  { %v4063_v23 = vpop.eup %4062  ;;  %3928 = vmatpush3.msra.mxu1 %v2931_v55  ;;  %3929 = vmatprep.mubr.msk.f32.mxu1 %vm4149_vm1, %v4146_v12  ;;  %v2548_v17 = vmul.f32 %v4061_v21, %v4634_v46 }
 0xa4d   :  { %3934 = vmatprep.mubr.msk.f32.mxu0 %vm4149_vm1, %v4146_v12  ;;  %3937 = vmatprep.subr.mxu1 %v4146_v12  ;;  %v2547_v19 = vmul.f32 %v4063_v23, %v4636_v47  ;;  %v58_v23 = vld [vmem:[%s4782_s1 + $0x40] sm:$0xff] }
 0xa4e   :  { %3935 = vmatmul.mubr.msk.f32.vlgmr.msra.gmra.mxu0 %vm175_vm2, %v2548_v17  ;;  %3942 = vmatprep.subr.mxu0 %v3199_v26  ;;  %v55_v17 = vld [vmem:[%s4782_s1 + $0x28] sm:$0xff] }
 0xa4f   :  { %3930 = vmatmul.mubr.msk.f32.vlgmr.msra.gmra.mxu1 %vm175_vm2, %v2547_v19  ;;  %3943 = vmatpush3.msra.mxu0 %v3199_v26  ;;  %v52_v19 = vld [vmem:[%s4782_s1 + $0x10] sm:$0xff] }
 0xa50   :  { %v4065_v3 = vpop.eup %4064  ;;  %3938 = vmatpush3.msra.mxu1 %v3083_v0  ;;  %3939 = vmatprep.mubr.msk.f32.mxu1 %vm4149_vm1, %v4146_v12  ;;  %v3419_v0 = vld [vmem:[%s4783_s2 + $0x38] sm:$0xff] }
 0xa51   :  { %v2549_v18 = vmul.f32 %v4065_v3, %v4642_v50  ;;  %3944 = vmatprep.subr.mxu0 %v3197_v16  ;;  %v3418_v3 = vld [vmem:[%s4783_s2 + $0x30] sm:$0xff] }
 0xa52   :  { %3945 = vmatpush3.msra.mxu0 %v3197_v16  ;;  %v3416_v16 = vld [vmem:[%s4783_s2 + $0x20] sm:$0xff] }
 0xa53   :  { %3940 = vmatmul.mubr.msk.f32.vlgmr.msra.gmra.mxu1 %vm175_vm2, %v2549_v18  ;;  %3946 = vmatprep.subr.mxu0 %v3195_v27  ;;  %v3417_v18 = vld [vmem:[%s4783_s2 + $0x28] sm:$0xff] }
 0xa54   :  { %3947 = vmatpush3.msra.mxu0 %v3195_v27 }
 0xaae   :  { %v2698_v28 = vpop.f32.mrf.mxu1 }
 0xab0   :  { %v3911_v29 = vpop.f32.mrf.mxu1 }
 0xab2   :  { %v2622_v32 = vpop.f32.mrf.mxu0 }
 0xab4   :  { %v3906_v34 = vpop.f32.mrf.mxu0 }
 0xb06   :  { %v2774_v35 = vpop.f32.mrf.mxu0 }
 0xb08   :  { %v3916_v36 = vpop.f32.mrf.mxu0 }
 0xb0a   :  { %v2926_v12 = vpop.f32.mrf.mxu0 }
 0xb0b   :  { %v2850_v37 = vpop.f32.mrf.mxu1  ;;  %3168 = vrot.lane.b32.xlu1 %v2926_v12, %s4154_s13 }
 0xb0c   :  { %3162 = vrot.lane.b32.xlu0 %v2850_v37, %s4144_s19  ;;  %v3926_v38 = vpop.f32.mrf.mxu0 }
 0xb0d   :  { %v3921_v39 = vpop.f32.mrf.mxu1 }
 0xb0e   :  { %v3078_v40 = vpop.f32.mrf.mxu0 }
 0xb0f   :  { %v3002_v41 = vpop.f32.mrf.mxu1  ;;  %3176 = vrot.lane.b32.xlu1 %v3078_v40, %s4155_s14 }
 0xb10   :  { %3160 = vrot.lane.b32.xlu0 %v2774_v35, %s4144_s19  ;;  %v3936_v42 = vpop.f32.mrf.mxu0  ;;  %v4737_v35 = vld [vmem:[#allocation5 + $0x8] sm:$0xff] }
 0xb11   :  { %v3931_v43 = vpop.f32.mrf.mxu1  ;;  %v3316_v36 = vrot.slane %v4737_v35, %v68_v8  ;;  %v3322_v37 = vrot.slane %v4737_v35, %v1739_v59  ;;  %v3415_v8 = vld [vmem:[%s4783_s2 + $0x18] sm:$0xff]  ;;  %v3414_v59 = vld [vmem:[%s4783_s2 + $0x10] sm:$0xff] }
 0xb13   :  { %v3154_v31 = vpop.f32.mrf.mxu1 }
 0xb14   :  { %3170 = vrot.lane.b32.xlu0 %v3002_v41, %s4154_s13  ;;  %3178 = vrot.lane.b32.xlu1 %v3154_v31, %s4155_s14 }
 0xb15   :  { %v3941_v45 = vpop.f32.mrf.mxu1 }
 0xb16   :  { %v3413_v45 = vld [vmem:[%s4783_s2 + $0x8] sm:$0xff] }
 0xb18   :  { %3192 = vrot.lane.b32.xlu0 %v4481_v1, %s4153_s12 }
 0xb7d   :  { %v3169_v33 = vpop.permute.xlu1 %3168 }
 0xb7e   :  { %v3163_v44 = vpop.permute.xlu0 %3162 }
 0xb7f   :  { %v3183_v52 = vsel %vm175_vm2, %v2698_v28, %v3163_v44  ;;  %v3327_v44 = vsub.s32 5, %v4230_v7 }
 0xb81   :  { %v3177_v47 = vpop.permute.xlu1 %3176 }
 0xb82   :  { %v3161_v46 = vpop.permute.xlu0 %3160 }
 0xb83   :  { %v3182_v48 = vsel %vm175_vm2, %v2622_v32, %v3161_v46  ;;  %v3328_v46 = vrot.slane %v4702_v30, %v3327_v44 }
 0xb84   :  { %v3184_v49 = vsel %vm1504_vm4, %v3182_v48, %v3169_v33  ;;  %v3412_v33 = vld [vmem:[%s4783_s2] sm:$0xff]  ;;  %s4156_s2 = smov [#allocation7]  }
 0xb85   :  { %v3186_v50 = vsel %vm1507_vm5, %v3184_v49, %v3177_v47  ;;  %s3553_s22 = sshll.u32 %s4156_s2, 4  ;;  %s3554_s22 = int_to_ptr.vmem [resolvable:$true] %s3553_s22 }
 0xb86   :  { %3950 = vmatprep.mubr.msk.f32.mxu0 %vm70_vm0, %v3186_v50  ;;  %v3171_v51 = vpop.permute.xlu0 %3170  ;;  %v3179_v54 = vpop.permute.xlu1 %3178  ;;  %s4116_s23 = scalar_lea.vmem %s3554_s22, 256  ;;  %p4121_p11 = scmp.lt.s32.totalorder %s3554_s22, %s3554_s22 }
 0xb87   :  { %v3185_v53 = vsel %vm1504_vm4, %v3183_v52, %v3171_v51  ;;  %p4117_p10 = scmp.ne.s32.totalorder %s3554_s22, %s4116_s23  ;;  %p4122_p12 = scmp.lt.s32.totalorder %s4116_s23, %s4116_s23 }
 0xb88   :  { %v3187_v1 = vsel %vm1507_vm5, %v3185_v53, %v3179_v54  ;;  %v3422_v53 = vsub.s32 6, %v4230_v7 }
 0xb89   :  { %p4123_p13 = por %p4122_p12, %p4121_p11 }
 0xb8a   :  { %v3193_v55 = vpop.permute.xlu0 %3192  ;;  %v3423_v54 = vrot.slane %v4702_v30, %v3422_v53 }
 0xb8b   :  { %3948 = vmatprep.subr.mxu0 %v3193_v55  ;;  %p4124_p0 = pnand %p4123_p13, %p4117_p10 }
 0xb8c   :  { %3949 = vmatpush3.msra.mxu0 %v3193_v55 }
 0xb8d   :  { %3951 = vmatmul.mubr.msk.f32.vlgmr.msra.gmra.mxu0 %vm70_vm0, %v3187_v1  ;;  %3964 = vmatprep.subr.mxu0 %v3419_v0 }
 0xb8e   :  { %3965 = vmatpush3.msra.mxu0 %v3419_v0  ;;  %v3543_v0 = vrot.slane %v4737_v35, %v3190_v56 }
 0xb8f   :  { %3966 = vmatprep.subr.mxu0 %v3418_v3 }
 0xb90   :  { %3967 = vmatpush3.msra.mxu0 %v3418_v3 }
 0xb91   :  { %3968 = vmatprep.subr.mxu0 %v3417_v18 }
 0xb92   :  { %3969 = vmatpush3.msra.mxu0 %v3417_v18 }
 0xb93   :  { %3970 = vmatprep.subr.mxu0 %v3416_v16 }
 0xb94   :  { %3971 = vmatpush3.msra.mxu0 %v3416_v16 }
 0xb95   :  { %3972 = vmatprep.subr.mxu0 %v3415_v8 }
 0xb96   :  { %3973 = vmatpush3.msra.mxu0 %v3415_v8 }
 0xb97   :  { %3974 = vmatprep.subr.mxu0 %v3414_v59 }
 0xb98   :  { %3975 = vmatpush3.msra.mxu0 %v3414_v59 }
 0xb99   :  { %3976 = vmatprep.subr.mxu0 %v3413_v45 }
 0xb9a   :  { %3977 = vmatpush3.msra.mxu0 %v3413_v45 }
 0xb9b   :  { %3978 = vmatprep.subr.mxu0 %v3412_v33 }
 0xb9c   :  { %3979 = vmatpush3.msra.mxu0 %v3412_v33 }
 0xc4d   :  { %v3952_v2 = vpop.f32.mrf.mxu0 }
 0xc4e   :  { %v3282_v5 = vadd.f32 %v3952_v2, %v3191_v24 }
 0xc4f   :  { %v3276_v14 = vpop.f32.mrf.mxu0 }
 0xc50   :  { %v3286_v15 = vadd.f32 %v3282_v5, %v4503_v58  ;;  %v3277_v60 = vadd.f32 %v3276_v14, %v3191_v24 }
 0xc52   :  { %v3285_v62 = vadd.f32 %v3277_v60, %v4501_v57  ;;  %v3290_v6 = vsel %vm70_vm0, %v3286_v15, 0.0  ;;  %v61_v57 = vld [vmem:[%s4782_s1 + $0x58] sm:$0xff] }
 0xc53   :  { %3291 = vadd.xlane.f32.xlu1 %v3290_v6  ;;  %3953 = vmatprep.subr.mxu1 %v61_v57 }
 0xc54   :  { %v3287_v4 = vsel %vm70_vm0, %v3285_v62, 0.0  ;;  %3954 = vmatpush3.msra.mxu1 %v61_v57 }
 0xc55   :  { %3288 = vadd.xlane.f32.xlu0 %v3287_v4  ;;  %3955 = vmatprep.subr.mxu1 %v58_v23 }
 0xc56   :  { %3956 = vmatpush3.msra.mxu1 %v58_v23 }
 0xc57   :  { %3957 = vmatprep.subr.mxu1 %v55_v17 }
 0xc58   :  { %3958 = vmatpush3.msra.mxu1 %v55_v17  ;;  %v3537_v17 = vrot.slane %v4737_v35, %v1512_v13 }
 0xc59   :  { %3959 = vmatprep.subr.mxu1 %v52_v19 }
 0xc5a   :  { %3960 = vmatpush3.msra.mxu1 %v52_v19 }
 0xcdc   :  { %v3292_v10 = vpop.xlane.xlu1 %3291 }
 0xcdd   :  { %v3294_v11 = vmul.f32 0.03125, %v3292_v10 }
 0xcde   :  { %v3289_v22 = vpop.xlane.xlu0 %3288 }
 0xcdf   :  { %v3293_v63 = vmul.f32 0.03125, %v3289_v22  ;;  %v3296_v25 = vsub.f32 %v3286_v15, %v3294_v11 }
 0xce1   :  { %v3295_v20 = vsub.f32 %v3285_v62, %v3293_v63  ;;  %v3298_v21 = vmul.f32 %v3296_v25, %v3296_v25 }
 0xce3   :  { %v3297_v9 = vmul.f32 %v3295_v20, %v3295_v20  ;;  %v3302_v58 = vsel %vm70_vm0, %v3298_v21, 0.0 }
 0xce5   :  { %v3299_v61 = vsel %vm70_vm0, %v3297_v9, 0.0 }
 0xce6   :  { %3300 = vadd.xlane.f32.xlu0 %v3299_v61 }
 0xcea   :  { %3303 = vadd.xlane.f32.xlu0 %v3302_v58 }
 0xd6f   :  { %v3301_v26 = vpop.xlane.xlu0 %3300 }
 0xd70   :  { %v3305_v27 = vmul.f32 0.03125, %v3301_v26 }
 0xd72   :  { %v3307_v28 = vadd.f32 1e-05, %v3305_v27 }
 0xd73   :  { %v3304_v29 = vpop.xlane.xlu0 %3303 }
 0xd74   :  { %4066 = vrsqrt.f32 %v3307_v28  ;;  %v3306_v32 = vmul.f32 0.03125, %v3304_v29 }
 0xd76   :  { %v3308_v34 = vadd.f32 1e-05, %v3306_v32 }
 0xd78   :  { %4068 = vrsqrt.f32 %v3308_v34 }
 0xd81   :  { %v4067_v12 = vpop.eup %4066 }
 0xd82   :  { %v3311_v38 = vmul.f32 %v4067_v12, %v3295_v20 }
 0xd84   :  { %v3317_v39 = vmul.f32 %v3316_v36, %v3311_v38 }
 0xd85   :  { %v4069_v40 = vpop.eup %4068 }
 0xd86   :  { %v3312_v41 = vmul.f32 %v4069_v40, %v3296_v25  ;;  %v3323_v42 = vadd.f32 %v3322_v37, %v3317_v39 }
 0xd88   :  { %3961 = vmatprep.mubr.msk.f32.mxu1 %vm70_vm0, %v3323_v42  ;;  %v3318_v43 = vmul.f32 %v3316_v36, %v3312_v41 }
 0xd8a   :  { %v3324_v31 = vadd.f32 %v3322_v37, %v3318_v43 }
 0xd8c   :  { %3962 = vmatmul.mubr.msk.f32.vlgmr.msra.gmra.mxu1 %vm70_vm0, %v3324_v31 }
 0xe4c   :  { %v3963_v47 = vpop.f32.mrf.mxu1 }
 0xe4d   :  { %v3407_v48 = vadd.f32 %v3963_v47, %v3328_v46 }
 0xe4e   :  { %v3401_v49 = vpop.f32.mrf.mxu1 }
 0xe4f   :  { %v3402_v50 = vadd.f32 %v3401_v49, %v3328_v46  ;;  %v3411_v52 = vmax.f32 %v3407_v48, 0.0 }
 0xe51   :  { %v3410_v51 = vmax.f32 %v3402_v50, 0.0 }
 0xe53   :  { %3980 = vmatprep.mubr.msk.f32.mxu0 %vm3424_vm6, %v3410_v51 }
 0xe54   :  { %3981 = vmatmul.mubr.msk.f32.vlgmr.msra.gmra.mxu0 %vm3424_vm6, %v3411_v52 }
 0xf14   :  { %v3982_v55 = vpop.f32.mrf.mxu0 }
 0xf15   :  { %v3503_v1 = vadd.f32 %v3982_v55, %v3423_v54 }
 0xf16   :  { %v3497_v24 = vpop.f32.mrf.mxu0 }
 0xf17   :  { %v3507_v2 = vadd.f32 %v3503_v1, %v3324_v31  ;;  %v3498_v5 = vadd.f32 %v3497_v24, %v3423_v54 }
 0xf19   :  { %v3506_v14 = vadd.f32 %v3498_v5, %v3323_v42  ;;  %v3511_v15 = vsel %vm70_vm0, %v3507_v2, 0.0 }
 0xf1a   :  { %3512 = vadd.xlane.f32.xlu0 %v3511_v15 }
 0xf1b   :  { %v3508_v60 = vsel %vm70_vm0, %v3506_v14, 0.0 }
 0xf1c   :  { %3509 = vadd.xlane.f32.xlu1 %v3508_v60 }
 0xfa3   :  { %v3513_v62 = vpop.xlane.xlu0 %3512 }
 0xfa4   :  { %v3515_v6 = vmul.f32 0.03125, %v3513_v62 }
 0xfa5   :  { %v3510_v4 = vpop.xlane.xlu1 %3509 }
 0xfa6   :  { %v3517_v10 = vsub.f32 %v3507_v2, %v3515_v6  ;;  %v3514_v11 = vmul.f32 0.03125, %v3510_v4 }
 0xfa8   :  { %v3516_v22 = vsub.f32 %v3506_v14, %v3514_v11  ;;  %v3519_v63 = vmul.f32 %v3517_v10, %v3517_v10 }
 0xfaa   :  { %v3523_v30 = vsel %vm70_vm0, %v3519_v63, 0.0  ;;  %v3518_v25 = vmul.f32 %v3516_v22, %v3516_v22 }
 0xfab   :  { %3524 = vadd.xlane.f32.xlu0 %v3523_v30 }
 0xfac   :  { %v3520_v20 = vsel %vm70_vm0, %v3518_v25, 0.0 }
 0xfad   :  { %3521 = vadd.xlane.f32.xlu1 %v3520_v20 }
0x1034   :  { %v3525_v9 = vpop.xlane.xlu0 %3524 }
0x1035   :  { %v3527_v61 = vmul.f32 0.03125, %v3525_v9 }
0x1036   :  { %v3522_v21 = vpop.xlane.xlu1 %3521 }
0x1037   :  { %v3529_v58 = vadd.f32 1e-05, %v3527_v61  ;;  %v3526_v57 = vmul.f32 0.03125, %v3522_v21 }
0x1039   :  { %4070 = vrsqrt.f32 %v3529_v58  ;;  %v3528_v23 = vadd.f32 1e-05, %v3526_v57 }
0x103b   :  { %4072 = vrsqrt.f32 %v3528_v23 }
0x1046   :  { %v4071_v19 = vpop.eup %4070 }
0x1047   :  { %v3533_v3 = vmul.f32 %v4071_v19, %v3517_v10 }
0x1048   :  { %v4073_v18 = vpop.eup %4072 }
0x1049   :  { %v3532_v16 = vmul.f32 %v4073_v18, %v3516_v22  ;;  %v3539_v26 = vmul.f32 %v3537_v17, %v3533_v3 }
0x104b   :  { %v3538_v27 = vmul.f32 %v3537_v17, %v3532_v16  ;;  %v3545_v28 = vadd.f32 %v3543_v0, %v3539_v26 }
0x104d   :  { %v3544_v29 = vadd.f32 %v3543_v0, %v3538_v27  ;;  %3547 = vst.msk [vmem:[#allocation7 + $0x8] sm:$0xff] %vm70_vm0, %v3545_v28 }
0x104f   :  { %3546 = vst.msk [vmem:[#allocation7] sm:$0xff] %vm70_vm0, %v3544_v29 }
0x1050   :  { %4127 = shalt.err (!%p4124_p0)
}
0x1051   :  { %3559 = dma.vmem_to_hbm [thread:$0]  %s3554_s22, 256, %s4785_s4, [#allocation4], %s4143_s18, %s4143_s18, %s4144_s19  }
0x1052   :  { %4140 = dma.done.wait [#allocation4], 256  }
0x1053   :  { %4141 = vsyncadd [#allocation4], 4294967040 }
0x1054   :  { %3563 = vsyncpa [#allocation3], 1 }
0x1055   :  { %3564 = vsyncpa [#allocation6], 1 }
0x1056   :  { %3565 = vsyncpa [#allocation4], 1 }

</bundles_post_ra>
